<compile_context>
chip_gen: v7x
topology: tpu7x:2x2x1
jax: 0.10.0
libtpu: 0.0.40
codegen_flags: <defaults>
</compile_context>

<pallas_src>
import numpy as np

import jax
import jax.numpy as jnp
from jax import lax
from jax.experimental import pallas as pl
from jax.experimental.pallas import tpu as pltpu


# ----------------------------------------------------------------------------
# Constant 0/1 gather/scatter matrices (spatial re-layout done on the MXU)
# ----------------------------------------------------------------------------
def _pool_scatter(ho, wp_in, row_off, col_off, wp_out, l_out):
    """MaxPool2d(2,2) gather + scatter into the next stage's padded flat buffer.

    The kernel computes m[c, r] = max of the 2x2 window whose top-left conv
    output is at flat index r (conv row stride wp_in).  This matrix picks
    r = 2i*wp_in + 2j and drops it at (i+row_off)*wp_out + (j+col_off) of the
    next zero-padded stage input:  p_next = m @ S.
    """
    n_src = (ho - 1) * wp_in - 1
    s = np.zeros((n_src, l_out), np.float32)
    for i in range(ho // 2):
        for j in range((wp_in - 2) // 2):
            s[2 * i * wp_in + 2 * j, (i + row_off) * wp_out + (j + col_off)] = 1.0
    return s


def _phase_scatter(hin, win, out_stride, l_out):
    """Interleaves the 4 stride-2 deconv phase outputs into the next flat buffer.

    Phase (py,px) output at (a,b) (row stride win+1) goes to output pixel
    (2a+py, 2b+px), i.e. flat index (2a+py)*out_stride + (2b+px).
    """
    rd = hin * (win + 1)
    s = np.zeros((4, rd, l_out), np.float32)
    for py in range(2):
        for px in range(2):
            ph = 2 * py + px
            for a in range(hin):
                for b in range(win):
                    s[ph, a * (win + 1) + b,
                      (2 * a + py) * out_stride + (2 * b + px)] = 1.0
    return s


_SEL1 = _pool_scatter(16, 18, 1, 1, 10, 110)   # (269, 110) pool1 -> padded enc2 input
_SEL2 = _pool_scatter(8, 10, 0, 0, 5, 30)      # (69, 30)   pool2 -> dec1 input
_SC1 = _phase_scatter(4, 4, 9, 90)             # (4, 20, 90)  dec1 phases -> dec2 input
_SC2 = _phase_scatter(8, 8, 16, 256)           # (4, 72, 256) dec2 phases -> output


# ----------------------------------------------------------------------------
# Weight packing (PyTorch layouts -> fat-K matmul operands, bias folded in)
# ----------------------------------------------------------------------------
def _pack_conv(wt, b):
    """Conv2d weight (Co,Ci,3,3) + bias (Co,) -> (Co, 9*Ci+1); bias = last column."""
    co, ci = wt.shape[0], wt.shape[1]
    w = jnp.transpose(wt, (0, 2, 3, 1)).reshape(co, 9 * ci)  # cols = (ky*3+kx)*Ci + c
    return jnp.concatenate([w, b.reshape(co, 1)], axis=1).astype(jnp.float32)


# ConvTranspose2d(k=3,s=2,p=1,op=1) phase decomposition.  Taps are flat offsets
# {0, 1, stride, stride+1} of the right/bottom zero-padded deconv input:
# t0=(0,0), t1=(0,+1), t2=(+1,0), t3=(+1,+1).  Phase ph = 2*py + px.
_PHASE_TAPS = {
    0: [(0, 1, 1)],                                   # out (2a,   2b)
    1: [(0, 1, 2), (1, 1, 0)],                        # out (2a,   2b+1)
    2: [(0, 2, 1), (2, 0, 1)],                        # out (2a+1, 2b)
    3: [(0, 2, 2), (1, 2, 0), (2, 0, 2), (3, 0, 0)],  # out (2a+1, 2b+1)
}


def _pack_deconv(wt, b):
    """ConvTranspose2d weight (Ci,Co,3,3) + bias (Co,) -> (4*Co, 4*Ci+1).

    Rows are grouped by output-pixel-parity phase, columns by tap*Ci + cin;
    bias folded into the last column; unused (phase, tap) blocks are zero.
    """
    ci, co = wt.shape[0], wt.shape[1]
    w = jnp.zeros((4 * co, 4 * ci + 1), jnp.float32)
    for ph, taps in _PHASE_TAPS.items():
        for t, ky, kx in taps:
            w = w.at[ph * co:(ph + 1) * co, t * ci:(t + 1) * ci].set(wt[:, :, ky, kx].T)
        w = w.at[ph * co:(ph + 1) * co, 4 * ci].set(b)
    return w


# ----------------------------------------------------------------------------
# The fused Pallas kernel: one grid step = one image, whole forward pass
# ----------------------------------------------------------------------------
def _autoencoder_kernel(x_ref, w1_ref, sel1_ref, w2_ref, sel2_ref,
                        w3_ref, sc1_ref, w4_ref, sc2_ref, o_ref, pad_ref):
    f32 = jnp.float32

    def im2col(src, offsets, width):
        # src: (Ci, L) zero-padded flat activation.  One lane-slice per tap, plus
        # a ones row that folds the bias into the matmul contraction.
        rows = [src[:, o:o + width] for o in offsets]
        rows.append(jnp.ones((1, width), f32))
        return jnp.concatenate(rows, axis=0)

    # ---- encoder conv1: 3x3 SAME 3->16 + ReLU (one matmul, K=28) ------------
    x = x_ref[0]                                            # (3, 256) = (C, H*W)
    pad_ref[...] = jnp.zeros((3, 342), f32)                 # zero-padded 19x18 rows
    for h in range(16):                                     # SAME padding in VMEM
        c0 = (h + 1) * 18 + 1
        pad_ref[:, c0:c0 + 16] = x[:, h * 16:(h + 1) * 16]
    xp = pad_ref[...]                                       # (3, 342)

    offs = tuple(ky * 18 + kx for ky in range(3) for kx in range(3))
    y = jnp.dot(w1_ref[...], im2col(xp, offs, 288),
                preferred_element_type=f32)                 # (16, 288)
    y = jnp.maximum(y, 0.0)

    # fused MaxPool2d(2,2): neighbour maxes + constant gather/scatter matmul
    m = jnp.maximum(y[:, 0:287], y[:, 1:288])
    m = jnp.maximum(m[:, 0:269], m[:, 18:287])              # (16, 269)
    p2 = jnp.dot(m, sel1_ref[...], preferred_element_type=f32)    # (16, 110)

    # ---- encoder conv2: 3x3 SAME 16->8 + ReLU + MaxPool (K=145) -------------
    offs = tuple(ky * 10 + kx for ky in range(3) for kx in range(3))
    y = jnp.dot(w2_ref[...], im2col(p2, offs, 80),
                preferred_element_type=f32)                 # (8, 80)
    y = jnp.maximum(y, 0.0)
    m = jnp.maximum(y[:, 0:79], y[:, 1:80])
    m = jnp.maximum(m[:, 0:69], m[:, 10:79])                # (8, 69)
    p3 = jnp.dot(m, sel2_ref[...], preferred_element_type=f32)    # (8, 30)

    # ---- decoder deconv1 (8->16, stride 2): 4 phase convs + interleave ------
    y = jnp.dot(w3_ref[...], im2col(p3, (0, 1, 5, 6), 20),
                preferred_element_type=f32)                 # (64, 20) = 4 phases x 16
    y = jnp.maximum(y, 0.0)
    p4 = jnp.zeros((16, 90), f32)
    for ph in range(4):
        p4 = p4 + jnp.dot(y[ph * 16:(ph + 1) * 16, :], sc1_ref[ph],
                          preferred_element_type=f32)       # (16, 90)

    # ---- decoder deconv2 (16->3, stride 2) + sigmoid -------------------------
    y = jnp.dot(w4_ref[...], im2col(p4, (0, 1, 9, 10), 72),
                preferred_element_type=f32)                 # (12, 72) = 4 phases x 3
    y = jax.nn.sigmoid(y)
    out = jnp.zeros((3, 256), f32)
    for ph in range(4):
        out = out + jnp.dot(y[ph * 3:(ph + 1) * 3, :], sc2_ref[ph],
                            preferred_element_type=f32)     # (3, 256)
    o_ref[0] = out                                          # lane-dense store


# ----------------------------------------------------------------------------
# Wrapper
# ----------------------------------------------------------------------------
@jax.jit
def autoencoder_forward(x_nchw, params):
    n = x_nchw.shape[0]
    assert x_nchw.shape[1:] == (3, 16, 16), x_nchw.shape
    x = x_nchw.astype(jnp.float32).reshape(n, 3, 256)       # NCHW -> (N, C, H*W)

    w1 = _pack_conv(params["enc1_w"], params["enc1_b"])     # (16, 28)
    w2 = _pack_conv(params["enc2_w"], params["enc2_b"])     # (8, 145)
    w3 = _pack_deconv(params["dec1_w"], params["dec1_b"])   # (64, 33)
    w4 = _pack_deconv(params["dec2_w"], params["dec2_b"])   # (12, 65)

    def const(shape):
        return pl.BlockSpec(shape, lambda nn, _s=len(shape): (0,) * _s)

    out = pl.pallas_call(
        _autoencoder_kernel,
        out_shape=jax.ShapeDtypeStruct((n, 3, 256), jnp.float32),
        grid=(n,),
        in_specs=[
            pl.BlockSpec((1, 3, 256), lambda nn: (nn, 0, 0)),
            const((16, 28)), const((269, 110)),
            const((8, 145)), const((69, 30)),
            const((64, 33)), const((4, 20, 90)),
            const((12, 65)), const((4, 72, 256)),
        ],
        out_specs=pl.BlockSpec((1, 3, 256), lambda nn: (nn, 0, 0)),
        scratch_shapes=[pltpu.VMEM((3, 342), jnp.float32)],
        compiler_params=pltpu.CompilerParams(dimension_semantics=("parallel",)),
    )(x, w1, jnp.asarray(_SEL1), w2, jnp.asarray(_SEL2),
      w3, jnp.asarray(_SC1), w4, jnp.asarray(_SC2))
    return out.reshape(n, 3, 16, 16)


# ----------------------------------------------------------------------------
# Parameters (PyTorch-shaped, deterministic) and a pure-JAX reference
# ----------------------------------------------------------------------------
def init_params(key):
    ks = jax.random.split(key, 8)

    def u(k, shape, fan_in):
        bound = 1.0 / jnp.sqrt(float(fan_in))
        return jax.random.uniform(k, shape, jnp.float32, -bound, bound)

    return {
        "enc1_w": u(ks[0], (16, 3, 3, 3), 3 * 9),    # Conv2d(3, 16, 3)
        "enc1_b": u(ks[1], (16,), 3 * 9),
        "enc2_w": u(ks[2], (8, 16, 3, 3), 16 * 9),   # Conv2d(16, 8, 3)
        "enc2_b": u(ks[3], (8,), 16 * 9),
        "dec1_w": u(ks[4], (8, 16, 3, 3), 8 * 9),    # ConvTranspose2d(8, 16, 3)
        "dec1_b": u(ks[5], (16,), 8 * 9),
        "dec2_w": u(ks[6], (16, 3, 3, 3), 16 * 9),   # ConvTranspose2d(16, 3, 3)
        "dec2_b": u(ks[7], (3,), 16 * 9),
    }


def reference_forward(x_nchw, params):
    x = jnp.transpose(x_nchw, (0, 2, 3, 1)).astype(jnp.float32)
    dn = ("NHWC", "HWIO", "NHWC")

    def conv(x, wt, b):
        w = jnp.transpose(wt, (2, 3, 1, 0))
        y = lax.conv_general_dilated(x, w, (1, 1), "SAME", dimension_numbers=dn)
        return jax.nn.relu(y + b)

    def pool(x):
        return lax.reduce_window(x, -jnp.inf, lax.max,
                                 (1, 2, 2, 1), (1, 2, 2, 1), "VALID")

    def deconv(x, wt, b, act):
        w = jnp.transpose(wt[:, :, ::-1, ::-1], (2, 3, 0, 1))
        y = lax.conv_general_dilated(x, w, (1, 1), [(1, 2), (1, 2)],
                                     lhs_dilation=(2, 2), dimension_numbers=dn)
        y = y + b
        return jax.nn.relu(y) if act == "relu" else jax.nn.sigmoid(y)

    x = pool(conv(x, params["enc1_w"], params["enc1_b"]))
    x = pool(conv(x, params["enc2_w"], params["enc2_b"]))
    x = deconv(x, params["dec1_w"], params["dec1_b"], "relu")
    x = deconv(x, params["dec2_w"], params["dec2_b"], "sigmoid")
    return jnp.transpose(x, (0, 3, 1, 2))


if __name__ == "__main__":
    key = jax.random.PRNGKey(0)
    kx, kp = jax.random.split(key)
    x = jax.random.normal(kx, (2, 3, 16, 16), jnp.float32)   # NCHW like PyTorch
    params = init_params(kp)

    out = jax.block_until_ready(autoencoder_forward(x, params))
    assert out.shape == (2, 3, 16, 16), out.shape

    ref = reference_forward(x, params)
    err = float(jnp.max(jnp.abs(out - ref)))
    assert jnp.allclose(out, ref, rtol=1e-4, atol=1e-4), err

    print("KERNEL_OK")
</pallas_src>

<mosaic_0001>
module attributes {stable_mosaic.version = 11 : i64} {
  func.func @_autoencoder_kernel(%arg0: i32, %arg1: memref<1x3x256xf32, #tpu.memory_space<vmem>>, %arg2: memref<16x28xf32, #tpu.memory_space<vmem>>, %arg3: memref<269x110xf32, #tpu.memory_space<vmem>>, %arg4: memref<8x145xf32, #tpu.memory_space<vmem>>, %arg5: memref<69x30xf32, #tpu.memory_space<vmem>>, %arg6: memref<64x33xf32, #tpu.memory_space<vmem>>, %arg7: memref<4x20x90xf32, #tpu.memory_space<vmem>>, %arg8: memref<12x65xf32, #tpu.memory_space<vmem>>, %arg9: memref<4x72x256xf32, #tpu.memory_space<vmem>>, %arg10: memref<1x3x256xf32, #tpu.memory_space<vmem>>, %arg11: memref<3x342xf32, #tpu.memory_space<vmem>>) attributes {dimension_semantics = [#tpu.dimension_semantics<parallel>], iteration_bounds = array<i64: 2>, scalar_prefetch = 0 : i64, scratch_operands = 1 : i64, tpu.core_type = #tpu.core_type<tc>, window_params = [{transform_indices = @transform_0, window_bounds = array<i64: 1, 3, 256>}, {pipeline_mode = #tpu.pipeline_mode<synchronous>, transform_indices = @transform_1, window_bounds = array<i64: 16, 28>}, {pipeline_mode = #tpu.pipeline_mode<synchronous>, transform_indices = @transform_2, window_bounds = array<i64: 269, 110>}, {pipeline_mode = #tpu.pipeline_mode<synchronous>, transform_indices = @transform_3, window_bounds = array<i64: 8, 145>}, {pipeline_mode = #tpu.pipeline_mode<synchronous>, transform_indices = @transform_4, window_bounds = array<i64: 69, 30>}, {pipeline_mode = #tpu.pipeline_mode<synchronous>, transform_indices = @transform_5, window_bounds = array<i64: 64, 33>}, {pipeline_mode = #tpu.pipeline_mode<synchronous>, transform_indices = @transform_6, window_bounds = array<i64: 4, 20, 90>}, {pipeline_mode = #tpu.pipeline_mode<synchronous>, transform_indices = @transform_7, window_bounds = array<i64: 12, 65>}, {pipeline_mode = #tpu.pipeline_mode<synchronous>, transform_indices = @transform_8, window_bounds = array<i64: 4, 72, 256>}, {transform_indices = @transform_9, window_bounds = array<i64: 1, 3, 256>}]} {
    %c0 = arith.constant 0 : index
    %c0_0 = arith.constant 0 : index
    %c0_1 = arith.constant 0 : index
    %0 = vector.load %arg1[%c0, %c0_0, %c0_1] : memref<1x3x256xf32, #tpu.memory_space<vmem>>, vector<1x3x256xf32>
    %1 = vector.shape_cast %0 : vector<1x3x256xf32> to vector<3x256xf32>
    %cst = arith.constant 0.000000e+00 : f32
    %2 = vector.broadcast %cst : f32 to vector<3x342xf32>
    %c0_2 = arith.constant 0 : index
    %c0_3 = arith.constant 0 : index
    %3 = vector.load %arg11[%c0_2, %c0_3] : memref<3x342xf32, #tpu.memory_space<vmem>>, vector<3x342xf32>
    tpu.vector_store %arg11[%c0_2, %c0_3], %2 {strides = array<i32>} : memref<3x342xf32, #tpu.memory_space<vmem>>, vector<3x342xf32>,
    %4 = vector.extract_strided_slice %1 {offsets = [0, 0], sizes = [3, 16], strides = [1, 1]} : vector<3x256xf32> to vector<3x16xf32>
    %c0_4 = arith.constant 0 : index
    %c19 = arith.constant 19 : index
    %5 = vector.load %arg11[%c0_4, %c19] : memref<3x342xf32, #tpu.memory_space<vmem>>, vector<3x16xf32>
    tpu.vector_store %arg11[%c0_4, %c19], %4 {strides = array<i32>} : memref<3x342xf32, #tpu.memory_space<vmem>>, vector<3x16xf32>,
    %6 = vector.extract_strided_slice %1 {offsets = [0, 16], sizes = [3, 16], strides = [1, 1]} : vector<3x256xf32> to vector<3x16xf32>
    %c0_5 = arith.constant 0 : index
    %c37 = arith.constant 37 : index
    %7 = vector.load %arg11[%c0_5, %c37] : memref<3x342xf32, #tpu.memory_space<vmem>>, vector<3x16xf32>
    tpu.vector_store %arg11[%c0_5, %c37], %6 {strides = array<i32>} : memref<3x342xf32, #tpu.memory_space<vmem>>, vector<3x16xf32>,
    %8 = vector.extract_strided_slice %1 {offsets = [0, 32], sizes = [3, 16], strides = [1, 1]} : vector<3x256xf32> to vector<3x16xf32>
    %c0_6 = arith.constant 0 : index
    %c55 = arith.constant 55 : index
    %9 = vector.load %arg11[%c0_6, %c55] : memref<3x342xf32, #tpu.memory_space<vmem>>, vector<3x16xf32>
    tpu.vector_store %arg11[%c0_6, %c55], %8 {strides = array<i32>} : memref<3x342xf32, #tpu.memory_space<vmem>>, vector<3x16xf32>,
    %10 = vector.extract_strided_slice %1 {offsets = [0, 48], sizes = [3, 16], strides = [1, 1]} : vector<3x256xf32> to vector<3x16xf32>
    %c0_7 = arith.constant 0 : index
    %c73 = arith.constant 73 : index
    %11 = vector.load %arg11[%c0_7, %c73] : memref<3x342xf32, #tpu.memory_space<vmem>>, vector<3x16xf32>
    tpu.vector_store %arg11[%c0_7, %c73], %10 {strides = array<i32>} : memref<3x342xf32, #tpu.memory_space<vmem>>, vector<3x16xf32>,
    %12 = vector.extract_strided_slice %1 {offsets = [0, 64], sizes = [3, 16], strides = [1, 1]} : vector<3x256xf32> to vector<3x16xf32>
    %c0_8 = arith.constant 0 : index
    %c91 = arith.constant 91 : index
    %13 = vector.load %arg11[%c0_8, %c91] : memref<3x342xf32, #tpu.memory_space<vmem>>, vector<3x16xf32>
    tpu.vector_store %arg11[%c0_8, %c91], %12 {strides = array<i32>} : memref<3x342xf32, #tpu.memory_space<vmem>>, vector<3x16xf32>,
    %14 = vector.extract_strided_slice %1 {offsets = [0, 80], sizes = [3, 16], strides = [1, 1]} : vector<3x256xf32> to vector<3x16xf32>
    %c0_9 = arith.constant 0 : index
    %c109 = arith.constant 109 : index
    %15 = vector.load %arg11[%c0_9, %c109] : memref<3x342xf32, #tpu.memory_space<vmem>>, vector<3x16xf32>
    tpu.vector_store %arg11[%c0_9, %c109], %14 {strides = array<i32>} : memref<3x342xf32, #tpu.memory_space<vmem>>, vector<3x16xf32>,
    %16 = vector.extract_strided_slice %1 {offsets = [0, 96], sizes = [3, 16], strides = [1, 1]} : vector<3x256xf32> to vector<3x16xf32>
    %c0_10 = arith.constant 0 : index
    %c127 = arith.constant 127 : index
    %17 = vector.load %arg11[%c0_10, %c127] : memref<3x342xf32, #tpu.memory_space<vmem>>, vector<3x16xf32>
    tpu.vector_store %arg11[%c0_10, %c127], %16 {strides = array<i32>} : memref<3x342xf32, #tpu.memory_space<vmem>>, vector<3x16xf32>,
    %18 = vector.extract_strided_slice %1 {offsets = [0, 112], sizes = [3, 16], strides = [1, 1]} : vector<3x256xf32> to vector<3x16xf32>
    %c0_11 = arith.constant 0 : index
    %c145 = arith.constant 145 : index
    %19 = vector.load %arg11[%c0_11, %c145] : memref<3x342xf32, #tpu.memory_space<vmem>>, vector<3x16xf32>
    tpu.vector_store %arg11[%c0_11, %c145], %18 {strides = array<i32>} : memref<3x342xf32, #tpu.memory_space<vmem>>, vector<3x16xf32>,
    %20 = vector.extract_strided_slice %1 {offsets = [0, 128], sizes = [3, 16], strides = [1, 1]} : vector<3x256xf32> to vector<3x16xf32>
    %c0_12 = arith.constant 0 : index
    %c163 = arith.constant 163 : index
    %21 = vector.load %arg11[%c0_12, %c163] : memref<3x342xf32, #tpu.memory_space<vmem>>, vector<3x16xf32>
    tpu.vector_store %arg11[%c0_12, %c163], %20 {strides = array<i32>} : memref<3x342xf32, #tpu.memory_space<vmem>>, vector<3x16xf32>,
    %22 = vector.extract_strided_slice %1 {offsets = [0, 144], sizes = [3, 16], strides = [1, 1]} : vector<3x256xf32> to vector<3x16xf32>
    %c0_13 = arith.constant 0 : index
    %c181 = arith.constant 181 : index
    %23 = vector.load %arg11[%c0_13, %c181] : memref<3x342xf32, #tpu.memory_space<vmem>>, vector<3x16xf32>
    tpu.vector_store %arg11[%c0_13, %c181], %22 {strides = array<i32>} : memref<3x342xf32, #tpu.memory_space<vmem>>, vector<3x16xf32>,
    %24 = vector.extract_strided_slice %1 {offsets = [0, 160], sizes = [3, 16], strides = [1, 1]} : vector<3x256xf32> to vector<3x16xf32>
    %c0_14 = arith.constant 0 : index
    %c199 = arith.constant 199 : index
    %25 = vector.load %arg11[%c0_14, %c199] : memref<3x342xf32, #tpu.memory_space<vmem>>, vector<3x16xf32>
    tpu.vector_store %arg11[%c0_14, %c199], %24 {strides = array<i32>} : memref<3x342xf32, #tpu.memory_space<vmem>>, vector<3x16xf32>,
    %26 = vector.extract_strided_slice %1 {offsets = [0, 176], sizes = [3, 16], strides = [1, 1]} : vector<3x256xf32> to vector<3x16xf32>
    %c0_15 = arith.constant 0 : index
    %c217 = arith.constant 217 : index
    %27 = vector.load %arg11[%c0_15, %c217] : memref<3x342xf32, #tpu.memory_space<vmem>>, vector<3x16xf32>
    tpu.vector_store %arg11[%c0_15, %c217], %26 {strides = array<i32>} : memref<3x342xf32, #tpu.memory_space<vmem>>, vector<3x16xf32>,
    %28 = vector.extract_strided_slice %1 {offsets = [0, 192], sizes = [3, 16], strides = [1, 1]} : vector<3x256xf32> to vector<3x16xf32>
    %c0_16 = arith.constant 0 : index
    %c235 = arith.constant 235 : index
    %29 = vector.load %arg11[%c0_16, %c235] : memref<3x342xf32, #tpu.memory_space<vmem>>, vector<3x16xf32>
    tpu.vector_store %arg11[%c0_16, %c235], %28 {strides = array<i32>} : memref<3x342xf32, #tpu.memory_space<vmem>>, vector<3x16xf32>,
    %30 = vector.extract_strided_slice %1 {offsets = [0, 208], sizes = [3, 16], strides = [1, 1]} : vector<3x256xf32> to vector<3x16xf32>
    %c0_17 = arith.constant 0 : index
    %c253 = arith.constant 253 : index
    %31 = vector.load %arg11[%c0_17, %c253] : memref<3x342xf32, #tpu.memory_space<vmem>>, vector<3x16xf32>
    tpu.vector_store %arg11[%c0_17, %c253], %30 {strides = array<i32>} : memref<3x342xf32, #tpu.memory_space<vmem>>, vector<3x16xf32>,
    %32 = vector.extract_strided_slice %1 {offsets = [0, 224], sizes = [3, 16], strides = [1, 1]} : vector<3x256xf32> to vector<3x16xf32>
    %c0_18 = arith.constant 0 : index
    %c271 = arith.constant 271 : index
    %33 = vector.load %arg11[%c0_18, %c271] : memref<3x342xf32, #tpu.memory_space<vmem>>, vector<3x16xf32>
    tpu.vector_store %arg11[%c0_18, %c271], %32 {strides = array<i32>} : memref<3x342xf32, #tpu.memory_space<vmem>>, vector<3x16xf32>,
    %34 = vector.extract_strided_slice %1 {offsets = [0, 240], sizes = [3, 16], strides = [1, 1]} : vector<3x256xf32> to vector<3x16xf32>
    %c0_19 = arith.constant 0 : index
    %c289 = arith.constant 289 : index
    %35 = vector.load %arg11[%c0_19, %c289] : memref<3x342xf32, #tpu.memory_space<vmem>>, vector<3x16xf32>
    tpu.vector_store %arg11[%c0_19, %c289], %34 {strides = array<i32>} : memref<3x342xf32, #tpu.memory_space<vmem>>, vector<3x16xf32>,
    %c0_20 = arith.constant 0 : index
    %c0_21 = arith.constant 0 : index
    %36 = vector.load %arg11[%c0_20, %c0_21] : memref<3x342xf32, #tpu.memory_space<vmem>>, vector<3x342xf32>
    %c0_22 = arith.constant 0 : index
    %c0_23 = arith.constant 0 : index
    %37 = vector.load %arg2[%c0_22, %c0_23] : memref<16x28xf32, #tpu.memory_space<vmem>>, vector<16x28xf32>
    %38 = vector.extract_strided_slice %36 {offsets = [0, 0], sizes = [3, 288], strides = [1, 1]} : vector<3x342xf32> to vector<3x288xf32>
    %39 = vector.extract_strided_slice %36 {offsets = [0, 1], sizes = [3, 288], strides = [1, 1]} : vector<3x342xf32> to vector<3x288xf32>
    %40 = vector.extract_strided_slice %36 {offsets = [0, 2], sizes = [3, 288], strides = [1, 1]} : vector<3x342xf32> to vector<3x288xf32>
    %41 = vector.extract_strided_slice %36 {offsets = [0, 18], sizes = [3, 288], strides = [1, 1]} : vector<3x342xf32> to vector<3x288xf32>
    %42 = vector.extract_strided_slice %36 {offsets = [0, 19], sizes = [3, 288], strides = [1, 1]} : vector<3x342xf32> to vector<3x288xf32>
    %43 = vector.extract_strided_slice %36 {offsets = [0, 20], sizes = [3, 288], strides = [1, 1]} : vector<3x342xf32> to vector<3x288xf32>
    %44 = vector.extract_strided_slice %36 {offsets = [0, 36], sizes = [3, 288], strides = [1, 1]} : vector<3x342xf32> to vector<3x288xf32>
    %45 = vector.extract_strided_slice %36 {offsets = [0, 37], sizes = [3, 288], strides = [1, 1]} : vector<3x342xf32> to vector<3x288xf32>
    %46 = vector.extract_strided_slice %36 {offsets = [0, 38], sizes = [3, 288], strides = [1, 1]} : vector<3x342xf32> to vector<3x288xf32>
    %cst_24 = arith.constant 1.000000e+00 : f32
    %47 = vector.broadcast %cst_24 : f32 to vector<1x288xf32>
    %48 = tpu.concatenate %38, %39, %40, %41, %42, %43, %44, %45, %46, %47 in 0 : vector<3x288xf32>, vector<3x288xf32>, vector<3x288xf32>, vector<3x288xf32>, vector<3x288xf32>, vector<3x288xf32>, vector<3x288xf32>, vector<3x288xf32>, vector<3x288xf32>, vector<1x288xf32> -> vector<28x288xf32>
    %cst_25 = arith.constant dense<0.000000e+00> : vector<16x288xf32>
    %49 = tpu.matmul %37, %48, %cst_25 {dimension_numbers = #tpu.dot_dimension_numbers<[1], [0], [0], [1], [0, 0, 1, 1], [], []>} : vector<16x28xf32>, vector<28x288xf32>, vector<16x288xf32> -> vector<16x288xf32>
    %cst_26 = arith.constant 0.000000e+00 : f32
    %50 = vector.broadcast %cst_26 : f32 to vector<16x288xf32>
    %51 = arith.maximumf %49, %50 : vector<16x288xf32>
    %52 = vector.extract_strided_slice %51 {offsets = [0, 0], sizes = [16, 287], strides = [1, 1]} : vector<16x288xf32> to vector<16x287xf32>
    %53 = vector.extract_strided_slice %51 {offsets = [0, 1], sizes = [16, 287], strides = [1, 1]} : vector<16x288xf32> to vector<16x287xf32>
    %54 = arith.maximumf %52, %53 : vector<16x287xf32>
    %55 = vector.extract_strided_slice %54 {offsets = [0, 0], sizes = [16, 269], strides = [1, 1]} : vector<16x287xf32> to vector<16x269xf32>
    %56 = vector.extract_strided_slice %54 {offsets = [0, 18], sizes = [16, 269], strides = [1, 1]} : vector<16x287xf32> to vector<16x269xf32>
    %57 = arith.maximumf %55, %56 : vector<16x269xf32>
    %c0_27 = arith.constant 0 : index
    %c0_28 = arith.constant 0 : index
    %58 = vector.load %arg3[%c0_27, %c0_28] : memref<269x110xf32, #tpu.memory_space<vmem>>, vector<269x110xf32>
    %cst_29 = arith.constant dense<0.000000e+00> : vector<16x110xf32>
    %59 = tpu.matmul %57, %58, %cst_29 {dimension_numbers = #tpu.dot_dimension_numbers<[1], [0], [0], [1], [0, 0, 1, 1], [], []>} : vector<16x269xf32>, vector<269x110xf32>, vector<16x110xf32> -> vector<16x110xf32>
    %c0_30 = arith.constant 0 : index
    %c0_31 = arith.constant 0 : index
    %60 = vector.load %arg4[%c0_30, %c0_31] : memref<8x145xf32, #tpu.memory_space<vmem>>, vector<8x145xf32>
    %61 = vector.extract_strided_slice %59 {offsets = [0, 0], sizes = [16, 80], strides = [1, 1]} : vector<16x110xf32> to vector<16x80xf32>
    %62 = vector.extract_strided_slice %59 {offsets = [0, 1], sizes = [16, 80], strides = [1, 1]} : vector<16x110xf32> to vector<16x80xf32>
    %63 = vector.extract_strided_slice %59 {offsets = [0, 2], sizes = [16, 80], strides = [1, 1]} : vector<16x110xf32> to vector<16x80xf32>
    %64 = vector.extract_strided_slice %59 {offsets = [0, 10], sizes = [16, 80], strides = [1, 1]} : vector<16x110xf32> to vector<16x80xf32>
    %65 = vector.extract_strided_slice %59 {offsets = [0, 11], sizes = [16, 80], strides = [1, 1]} : vector<16x110xf32> to vector<16x80xf32>
    %66 = vector.extract_strided_slice %59 {offsets = [0, 12], sizes = [16, 80], strides = [1, 1]} : vector<16x110xf32> to vector<16x80xf32>
    %67 = vector.extract_strided_slice %59 {offsets = [0, 20], sizes = [16, 80], strides = [1, 1]} : vector<16x110xf32> to vector<16x80xf32>
    %68 = vector.extract_strided_slice %59 {offsets = [0, 21], sizes = [16, 80], strides = [1, 1]} : vector<16x110xf32> to vector<16x80xf32>
    %69 = vector.extract_strided_slice %59 {offsets = [0, 22], sizes = [16, 80], strides = [1, 1]} : vector<16x110xf32> to vector<16x80xf32>
    %cst_32 = arith.constant 1.000000e+00 : f32
    %70 = vector.broadcast %cst_32 : f32 to vector<1x80xf32>
    %71 = tpu.concatenate %61, %62, %63, %64, %65, %66, %67, %68, %69, %70 in 0 : vector<16x80xf32>, vector<16x80xf32>, vector<16x80xf32>, vector<16x80xf32>, vector<16x80xf32>, vector<16x80xf32>, vector<16x80xf32>, vector<16x80xf32>, vector<16x80xf32>, vector<1x80xf32> -> vector<145x80xf32>
    %cst_33 = arith.constant dense<0.000000e+00> : vector<8x80xf32>
    %72 = tpu.matmul %60, %71, %cst_33 {dimension_numbers = #tpu.dot_dimension_numbers<[1], [0], [0], [1], [0, 0, 1, 1], [], []>} : vector<8x145xf32>, vector<145x80xf32>, vector<8x80xf32> -> vector<8x80xf32>
    %cst_34 = arith.constant 0.000000e+00 : f32
    %73 = vector.broadcast %cst_34 : f32 to vector<8x80xf32>
    %74 = arith.maximumf %72, %73 : vector<8x80xf32>
    %75 = vector.extract_strided_slice %74 {offsets = [0, 0], sizes = [8, 79], strides = [1, 1]} : vector<8x80xf32> to vector<8x79xf32>
    %76 = vector.extract_strided_slice %74 {offsets = [0, 1], sizes = [8, 79], strides = [1, 1]} : vector<8x80xf32> to vector<8x79xf32>
    %77 = arith.maximumf %75, %76 : vector<8x79xf32>
    %78 = vector.extract_strided_slice %77 {offsets = [0, 0], sizes = [8, 69], strides = [1, 1]} : vector<8x79xf32> to vector<8x69xf32>
    %79 = vector.extract_strided_slice %77 {offsets = [0, 10], sizes = [8, 69], strides = [1, 1]} : vector<8x79xf32> to vector<8x69xf32>
    %80 = arith.maximumf %78, %79 : vector<8x69xf32>
    %c0_35 = arith.constant 0 : index
    %c0_36 = arith.constant 0 : index
    %81 = vector.load %arg5[%c0_35, %c0_36] : memref<69x30xf32, #tpu.memory_space<vmem>>, vector<69x30xf32>
    %cst_37 = arith.constant dense<0.000000e+00> : vector<8x30xf32>
    %82 = tpu.matmul %80, %81, %cst_37 {dimension_numbers = #tpu.dot_dimension_numbers<[1], [0], [0], [1], [0, 0, 1, 1], [], []>} : vector<8x69xf32>, vector<69x30xf32>, vector<8x30xf32> -> vector<8x30xf32>
    %c0_38 = arith.constant 0 : index
    %c0_39 = arith.constant 0 : index
    %83 = vector.load %arg6[%c0_38, %c0_39] : memref<64x33xf32, #tpu.memory_space<vmem>>, vector<64x33xf32>
    %84 = vector.extract_strided_slice %82 {offsets = [0, 0], sizes = [8, 20], strides = [1, 1]} : vector<8x30xf32> to vector<8x20xf32>
    %85 = vector.extract_strided_slice %82 {offsets = [0, 1], sizes = [8, 20], strides = [1, 1]} : vector<8x30xf32> to vector<8x20xf32>
    %86 = vector.extract_strided_slice %82 {offsets = [0, 5], sizes = [8, 20], strides = [1, 1]} : vector<8x30xf32> to vector<8x20xf32>
    %87 = vector.extract_strided_slice %82 {offsets = [0, 6], sizes = [8, 20], strides = [1, 1]} : vector<8x30xf32> to vector<8x20xf32>
    %cst_40 = arith.constant 1.000000e+00 : f32
    %88 = vector.broadcast %cst_40 : f32 to vector<1x20xf32>
    %89 = tpu.concatenate %84, %85, %86, %87, %88 in 0 : vector<8x20xf32>, vector<8x20xf32>, vector<8x20xf32>, vector<8x20xf32>, vector<1x20xf32> -> vector<33x20xf32>
    %cst_41 = arith.constant dense<0.000000e+00> : vector<64x20xf32>
    %90 = tpu.matmul %83, %89, %cst_41 {dimension_numbers = #tpu.dot_dimension_numbers<[1], [0], [0], [1], [0, 0, 1, 1], [], []>} : vector<64x33xf32>, vector<33x20xf32>, vector<64x20xf32> -> vector<64x20xf32>
    %cst_42 = arith.constant 0.000000e+00 : f32
    %91 = vector.broadcast %cst_42 : f32 to vector<64x20xf32>
    %92 = arith.maximumf %90, %91 : vector<64x20xf32>
    %cst_43 = arith.constant 0.000000e+00 : f32
    %93 = vector.broadcast %cst_43 : f32 to vector<16x90xf32>
    %94 = vector.extract_strided_slice %92 {offsets = [0, 0], sizes = [16, 20], strides = [1, 1]} : vector<64x20xf32> to vector<16x20xf32>
    %c0_44 = arith.constant 0 : index
    %c0_45 = arith.constant 0 : index
    %c0_46 = arith.constant 0 : index
    %95 = vector.load %arg7[%c0_44, %c0_45, %c0_46] : memref<4x20x90xf32, #tpu.memory_space<vmem>>, vector<1x20x90xf32>
    %96 = vector.shape_cast %95 : vector<1x20x90xf32> to vector<20x90xf32>
    %cst_47 = arith.constant dense<0.000000e+00> : vector<16x90xf32>
    %97 = tpu.matmul %94, %96, %cst_47 {dimension_numbers = #tpu.dot_dimension_numbers<[1], [0], [0], [1], [0, 0, 1, 1], [], []>} : vector<16x20xf32>, vector<20x90xf32>, vector<16x90xf32> -> vector<16x90xf32>
    %98 = arith.addf %93, %97 : vector<16x90xf32>
    %99 = vector.extract_strided_slice %92 {offsets = [16, 0], sizes = [16, 20], strides = [1, 1]} : vector<64x20xf32> to vector<16x20xf32>
    %c1 = arith.constant 1 : index
    %c0_48 = arith.constant 0 : index
    %c0_49 = arith.constant 0 : index
    %100 = vector.load %arg7[%c1, %c0_48, %c0_49] : memref<4x20x90xf32, #tpu.memory_space<vmem>>, vector<1x20x90xf32>
    %101 = vector.shape_cast %100 : vector<1x20x90xf32> to vector<20x90xf32>
    %cst_50 = arith.constant dense<0.000000e+00> : vector<16x90xf32>
    %102 = tpu.matmul %99, %101, %cst_50 {dimension_numbers = #tpu.dot_dimension_numbers<[1], [0], [0], [1], [0, 0, 1, 1], [], []>} : vector<16x20xf32>, vector<20x90xf32>, vector<16x90xf32> -> vector<16x90xf32>
    %103 = arith.addf %98, %102 : vector<16x90xf32>
    %104 = vector.extract_strided_slice %92 {offsets = [32, 0], sizes = [16, 20], strides = [1, 1]} : vector<64x20xf32> to vector<16x20xf32>
    %c2 = arith.constant 2 : index
    %c0_51 = arith.constant 0 : index
    %c0_52 = arith.constant 0 : index
    %105 = vector.load %arg7[%c2, %c0_51, %c0_52] : memref<4x20x90xf32, #tpu.memory_space<vmem>>, vector<1x20x90xf32>
    %106 = vector.shape_cast %105 : vector<1x20x90xf32> to vector<20x90xf32>
    %cst_53 = arith.constant dense<0.000000e+00> : vector<16x90xf32>
    %107 = tpu.matmul %104, %106, %cst_53 {dimension_numbers = #tpu.dot_dimension_numbers<[1], [0], [0], [1], [0, 0, 1, 1], [], []>} : vector<16x20xf32>, vector<20x90xf32>, vector<16x90xf32> -> vector<16x90xf32>
    %108 = arith.addf %103, %107 : vector<16x90xf32>
    %109 = vector.extract_strided_slice %92 {offsets = [48, 0], sizes = [16, 20], strides = [1, 1]} : vector<64x20xf32> to vector<16x20xf32>
    %c3 = arith.constant 3 : index
    %c0_54 = arith.constant 0 : index
    %c0_55 = arith.constant 0 : index
    %110 = vector.load %arg7[%c3, %c0_54, %c0_55] : memref<4x20x90xf32, #tpu.memory_space<vmem>>, vector<1x20x90xf32>
    %111 = vector.shape_cast %110 : vector<1x20x90xf32> to vector<20x90xf32>
    %cst_56 = arith.constant dense<0.000000e+00> : vector<16x90xf32>
    %112 = tpu.matmul %109, %111, %cst_56 {dimension_numbers = #tpu.dot_dimension_numbers<[1], [0], [0], [1], [0, 0, 1, 1], [], []>} : vector<16x20xf32>, vector<20x90xf32>, vector<16x90xf32> -> vector<16x90xf32>
    %113 = arith.addf %108, %112 : vector<16x90xf32>
    %c0_57 = arith.constant 0 : index
    %c0_58 = arith.constant 0 : index
    %114 = vector.load %arg8[%c0_57, %c0_58] : memref<12x65xf32, #tpu.memory_space<vmem>>, vector<12x65xf32>
    %115 = vector.extract_strided_slice %113 {offsets = [0, 0], sizes = [16, 72], strides = [1, 1]} : vector<16x90xf32> to vector<16x72xf32>
    %116 = vector.extract_strided_slice %113 {offsets = [0, 1], sizes = [16, 72], strides = [1, 1]} : vector<16x90xf32> to vector<16x72xf32>
    %117 = vector.extract_strided_slice %113 {offsets = [0, 9], sizes = [16, 72], strides = [1, 1]} : vector<16x90xf32> to vector<16x72xf32>
    %118 = vector.extract_strided_slice %113 {offsets = [0, 10], sizes = [16, 72], strides = [1, 1]} : vector<16x90xf32> to vector<16x72xf32>
    %cst_59 = arith.constant 1.000000e+00 : f32
    %119 = vector.broadcast %cst_59 : f32 to vector<1x72xf32>
    %120 = tpu.concatenate %115, %116, %117, %118, %119 in 0 : vector<16x72xf32>, vector<16x72xf32>, vector<16x72xf32>, vector<16x72xf32>, vector<1x72xf32> -> vector<65x72xf32>
    %cst_60 = arith.constant dense<0.000000e+00> : vector<12x72xf32>
    %121 = tpu.matmul %114, %120, %cst_60 {dimension_numbers = #tpu.dot_dimension_numbers<[1], [0], [0], [1], [0, 0, 1, 1], [], []>} : vector<12x65xf32>, vector<65x72xf32>, vector<12x72xf32> -> vector<12x72xf32>
    %122 = arith.negf %121 : vector<12x72xf32>
    %123 = math.exp %122 : vector<12x72xf32>
    %cst_61 = arith.constant 1.000000e+00 : f32
    %124 = vector.broadcast %cst_61 : f32 to vector<12x72xf32>
    %125 = arith.addf %124, %123 : vector<12x72xf32>
    %126 = arith.divf %124, %125 : vector<12x72xf32>
    %cst_62 = arith.constant 0.000000e+00 : f32
    %127 = vector.broadcast %cst_62 : f32 to vector<3x256xf32>
    %128 = vector.extract_strided_slice %126 {offsets = [0, 0], sizes = [3, 72], strides = [1, 1]} : vector<12x72xf32> to vector<3x72xf32>
    %c0_63 = arith.constant 0 : index
    %c0_64 = arith.constant 0 : index
    %c0_65 = arith.constant 0 : index
    %129 = vector.load %arg9[%c0_63, %c0_64, %c0_65] : memref<4x72x256xf32, #tpu.memory_space<vmem>>, vector<1x72x256xf32>
    %130 = vector.shape_cast %129 : vector<1x72x256xf32> to vector<72x256xf32>
    %cst_66 = arith.constant dense<0.000000e+00> : vector<3x256xf32>
    %131 = tpu.matmul %128, %130, %cst_66 {dimension_numbers = #tpu.dot_dimension_numbers<[1], [0], [0], [1], [0, 0, 1, 1], [], []>} : vector<3x72xf32>, vector<72x256xf32>, vector<3x256xf32> -> vector<3x256xf32>
    %132 = arith.addf %127, %131 : vector<3x256xf32>
    %133 = vector.extract_strided_slice %126 {offsets = [3, 0], sizes = [3, 72], strides = [1, 1]} : vector<12x72xf32> to vector<3x72xf32>
    %c1_67 = arith.constant 1 : index
    %c0_68 = arith.constant 0 : index
    %c0_69 = arith.constant 0 : index
    %134 = vector.load %arg9[%c1_67, %c0_68, %c0_69] : memref<4x72x256xf32, #tpu.memory_space<vmem>>, vector<1x72x256xf32>
    %135 = vector.shape_cast %134 : vector<1x72x256xf32> to vector<72x256xf32>
    %cst_70 = arith.constant dense<0.000000e+00> : vector<3x256xf32>
    %136 = tpu.matmul %133, %135, %cst_70 {dimension_numbers = #tpu.dot_dimension_numbers<[1], [0], [0], [1], [0, 0, 1, 1], [], []>} : vector<3x72xf32>, vector<72x256xf32>, vector<3x256xf32> -> vector<3x256xf32>
    %137 = arith.addf %132, %136 : vector<3x256xf32>
    %138 = vector.extract_strided_slice %126 {offsets = [6, 0], sizes = [3, 72], strides = [1, 1]} : vector<12x72xf32> to vector<3x72xf32>
    %c2_71 = arith.constant 2 : index
    %c0_72 = arith.constant 0 : index
    %c0_73 = arith.constant 0 : index
    %139 = vector.load %arg9[%c2_71, %c0_72, %c0_73] : memref<4x72x256xf32, #tpu.memory_space<vmem>>, vector<1x72x256xf32>
    %140 = vector.shape_cast %139 : vector<1x72x256xf32> to vector<72x256xf32>
    %cst_74 = arith.constant dense<0.000000e+00> : vector<3x256xf32>
    %141 = tpu.matmul %138, %140, %cst_74 {dimension_numbers = #tpu.dot_dimension_numbers<[1], [0], [0], [1], [0, 0, 1, 1], [], []>} : vector<3x72xf32>, vector<72x256xf32>, vector<3x256xf32> -> vector<3x256xf32>
    %142 = arith.addf %137, %141 : vector<3x256xf32>
    %143 = vector.extract_strided_slice %126 {offsets = [9, 0], sizes = [3, 72], strides = [1, 1]} : vector<12x72xf32> to vector<3x72xf32>
    %c3_75 = arith.constant 3 : index
    %c0_76 = arith.constant 0 : index
    %c0_77 = arith.constant 0 : index
    %144 = vector.load %arg9[%c3_75, %c0_76, %c0_77] : memref<4x72x256xf32, #tpu.memory_space<vmem>>, vector<1x72x256xf32>
    %145 = vector.shape_cast %144 : vector<1x72x256xf32> to vector<72x256xf32>
    %cst_78 = arith.constant dense<0.000000e+00> : vector<3x256xf32>
    %146 = tpu.matmul %143, %145, %cst_78 {dimension_numbers = #tpu.dot_dimension_numbers<[1], [0], [0], [1], [0, 0, 1, 1], [], []>} : vector<3x72xf32>, vector<72x256xf32>, vector<3x256xf32> -> vector<3x256xf32>
    %147 = arith.addf %142, %146 : vector<3x256xf32>
    %c0_79 = arith.constant 0 : index
    %c0_80 = arith.constant 0 : index
    %c0_81 = arith.constant 0 : index
    %148 = vector.load %arg10[%c0_79, %c0_80, %c0_81] : memref<1x3x256xf32, #tpu.memory_space<vmem>>, vector<1x3x256xf32>
    %149 = vector.shape_cast %148 : vector<1x3x256xf32> to vector<3x256xf32>
    %150 = vector.shape_cast %147 : vector<3x256xf32> to vector<1x3x256xf32>
    tpu.vector_store %arg10[%c0_79, %c0_80, %c0_81], %150 {strides = array<i32>} : memref<1x3x256xf32, #tpu.memory_space<vmem>>, vector<1x3x256xf32>,
    return
  }
  func.func @transform_0(%arg0: i32) -> (i32, i32, i32) {
    %c0_i32 = arith.constant 0 : i32
    %c0_i32_0 = arith.constant 0 : i32
    %c0_i32_1 = arith.constant 0 : i32
    return %arg0, %c0_i32, %c0_i32_0 : i32, i32, i32
  }
  func.func @transform_1(%arg0: i32) -> (i32, i32) {
    %c0_i32 = arith.constant 0 : i32
    %c0_i32_0 = arith.constant 0 : i32
    %c0_i32_1 = arith.constant 0 : i32
    return %c0_i32, %c0_i32_0 : i32, i32
  }
  func.func @transform_2(%arg0: i32) -> (i32, i32) {
    %c0_i32 = arith.constant 0 : i32
    %c0_i32_0 = arith.constant 0 : i32
    %c0_i32_1 = arith.constant 0 : i32
    return %c0_i32, %c0_i32_0 : i32, i32
  }
  func.func @transform_3(%arg0: i32) -> (i32, i32) {
    %c0_i32 = arith.constant 0 : i32
    %c0_i32_0 = arith.constant 0 : i32
    %c0_i32_1 = arith.constant 0 : i32
    return %c0_i32, %c0_i32_0 : i32, i32
  }
  func.func @transform_4(%arg0: i32) -> (i32, i32) {
    %c0_i32 = arith.constant 0 : i32
    %c0_i32_0 = arith.constant 0 : i32
    %c0_i32_1 = arith.constant 0 : i32
    return %c0_i32, %c0_i32_0 : i32, i32
  }
  func.func @transform_5(%arg0: i32) -> (i32, i32) {
    %c0_i32 = arith.constant 0 : i32
    %c0_i32_0 = arith.constant 0 : i32
    %c0_i32_1 = arith.constant 0 : i32
    return %c0_i32, %c0_i32_0 : i32, i32
  }
  func.func @transform_6(%arg0: i32) -> (i32, i32, i32) {
    %c0_i32 = arith.constant 0 : i32
    %c0_i32_0 = arith.constant 0 : i32
    %c0_i32_1 = arith.constant 0 : i32
    %c0_i32_2 = arith.constant 0 : i32
    return %c0_i32, %c0_i32_0, %c0_i32_1 : i32, i32, i32
  }
  func.func @transform_7(%arg0: i32) -> (i32, i32) {
    %c0_i32 = arith.constant 0 : i32
    %c0_i32_0 = arith.constant 0 : i32
    %c0_i32_1 = arith.constant 0 : i32
    return %c0_i32, %c0_i32_0 : i32, i32
  }
  func.func @transform_8(%arg0: i32) -> (i32, i32, i32) {
    %c0_i32 = arith.constant 0 : i32
    %c0_i32_0 = arith.constant 0 : i32
    %c0_i32_1 = arith.constant 0 : i32
    %c0_i32_2 = arith.constant 0 : i32
    return %c0_i32, %c0_i32_0, %c0_i32_1 : i32, i32, i32
  }
  func.func @transform_9(%arg0: i32) -> (i32, i32, i32) {
    %c0_i32 = arith.constant 0 : i32
    %c0_i32_0 = arith.constant 0 : i32
    %c0_i32_1 = arith.constant 0 : i32
    return %arg0, %c0_i32, %c0_i32_0 : i32, i32, i32
  }
}

</mosaic_0001>

<bundles_post_ra>
// kernel: autoencoder_forward.1
= control target key start
LH: loop header
LB: loop body
LE: loop exit
PB: predicated region body
PF: predicated region fallthrough
CT: control target
= control target key end

     0   :  { %s3148_s30 = smov 0   ;;  %s3846_s0 = inlined_call_operand.vmem [shape: f32[2,3,256], index: 0, kind: input, shape index: {}]   ;;  %s3847_s1 = inlined_call_operand.vmem [shape: f32[16,28], index: 1, kind: input, shape index: {}]   ;;  %s3848_s2 = inlined_call_operand.vmem [shape: f32[269,110], index: 2, kind: input, shape index: {}]   ;;  %s3849_s3 = inlined_call_operand.vmem [shape: f32[8,145], index: 3, kind: input, shape index: {}]   ;;  %s3850_s4 = inlined_call_operand.vmem [shape: f32[69,30], index: 4, kind: input, shape index: {}]   ;;  %s3851_s5 = inlined_call_operand.vmem [shape: f32[64,33], index: 5, kind: input, shape index: {}]   ;;  %s3852_s6 = inlined_call_operand.vmem [shape: f32[4,20,90], index: 6, kind: input, shape index: {}]   ;;  %s3853_s7 = inlined_call_operand.vmem [shape: f32[12,65], index: 7, kind: input, shape index: {}]   ;;  %s3854_s8 = inlined_call_operand.vmem [shape: f32[4,72,256], index: 8, kind: input, shape index: {}]   ;;  %s3855_s9 = inlined_call_operand.vmem [shape: f32[2,3,256], index: 9, kind: output, shape index: {}]  }
   0x1 LB: > { %s2329_s10 = sadd.s32 4294967295, %s3059_s30   ;;  %p2333_p0 = scmp.ge.s32.totalorder %s3059_s30, 1  ;;  %s3059_s30 = sphi %s3148_s30, %s19_s30  }
   0x2   : > { %p287_p1 = scmp.lt.s32.totalorder %s3059_s30, 3 }
   0x4   : > { %p288_p2 = pnand %p2333_p0, %p287_p1 }
   0x5   : > { %p323_p3 = scmp.lt.s32.totalorder (!%p288_p2), %s2329_s10, 1  ;;  %v3061_v0 = vmov (!%p288_p2), 0.0   ;;  %s3062_s15 = smov (!%p288_p2), 23   ;;  %vm335_vm0 = vcmask (!%p288_p2), 698368   ;;  %vm341_vm1 = vcmask (!%p288_p2), 280728   ;;  %vm346_vm2 = vcmask (!%p288_p2), 428328  }
   0x6   : > { %291 = sbr.rel (%p288_p2) target bundleno = 3049 (0xbe9), region = 56  ;;  %334 = vst [vmem:[#allocation2] sm:$0x77] (!%p288_p2), %v3061_v0  ;;  %680 = vmatprep.mubr.f32.mxu0 (!%p288_p2), %v3061_v0  ;;  %s3063_s16 = smov (!%p288_p2), 19   ;;  %336 = vst.msk [vmem:[#allocation2 + $0x8] sm:$0x7] (!%p288_p2), %vm335_vm0, %v3061_v0 }
   0x7   : > { %s3064_s17 = smov (!%p288_p2), 25   ;;  %s3065_s18 = smov (!%p288_p2), 21   ;;  %vm351_vm3 = vcmask (!%p288_p2), 575928   ;;  %vm356_vm4 = vcmask (!%p288_p2), 723528   ;;  %vm361_vm5 = vcmask (!%p288_p2), 871128   ;;  %vm374_vm6 = vcmask (!%p288_p2), 1043448  }
   0x8   : > { %s3066_s19 = smov (!%p288_p2), 27   ;;  %s3067_s20 = smov (!%p288_p2), 31   ;;  %vm375_vm7 = vcmask (!%p288_p2), 120836   ;;  %vm371_vm8 = vcmask (!%p288_p2), 252928   ;;  %vm366_vm9 = vcmask (!%p288_p2), 1018728   ;;  %vm386_vm11 = vcmask (!%p288_p2), 285696  }
   0x9   : > { %s3068_s21 = smov (!%p288_p2), 35   ;;  %s3069_s22 = smov (!%p288_p2), 29   ;;  %vm376_vm10 = vmor (!%p288_p2), %vm375_vm7, %vm374_vm6  ;;  %vm381_vm12 = vcmask (!%p288_p2), 264328   ;;  %vm389_vm13 = vcmask (!%p288_p2), 411928   ;;  %vm394_vm14 = vcmask (!%p288_p2), 302080   ;;  %vm397_vm15 = vcmask (!%p288_p2), 559528  }
   0xa   : > { %s3070_s23 = smov (!%p288_p2), 33   ;;  %s3071_s24 = smov (!%p288_p2), 37   ;;  %vm410_vm0 = vcmask (!%p288_p2), 334848   ;;  %vm426_vm6 = vcmask (!%p288_p2), 367616   ;;  %vm418_vm7 = vcmask (!%p288_p2), 351232  }
   0xb   : > { %s3072_s25 = smov (!%p288_p2), 41   ;;  %s3073_s26 = smov (!%p288_p2), 39  }
   0xc   : > { %s3074_s27 = smov (!%p288_p2), 45   ;;  %s3075_s28 = smov (!%p288_p2), 43  }
   0xd   : > { %s3859_s10 = smov (!%p323_p3, %s2329_s10), 1  ;;  %s3076_s29 = smov 47  }
   0xe   : > { %s2447_s11 = sshll.u32 %s3859_s10, 3  ;;  %s3077_s12 = smov 49  }
   0xf   : > { %s327_s14 = scalar_lea.vmem %s3846_s0, %s2447_s11  ;;  %s3078_s13 = smov 110  }
  0x10   : > { %v333_v1 = vld [vmem:[%s327_s14] sm:$0x77]  ;;  %s3079_s14 = smov 126  }
  0x11   : > { %348 = vrot.lane.b32.xlu1 %v333_v1, %s3062_s15  ;;  %338 = vrot.lane.b32.xlu0 %v333_v1, %s3063_s16  ;;  %s3080_s15 = smov 109   ;;  %s3081_s16 = smov 127  }
  0x15   : > { %353 = vrot.lane.b32.xlu1 %v333_v1, %s3064_s17  ;;  %343 = vrot.lane.b32.xlu0 %v333_v1, %s3065_s18  ;;  %s3082_s17 = smov 108   ;;  %s3083_s18 = smov 92  }
  0x19   : > { %358 = vrot.lane.b32.xlu1 %v333_v1, %s3066_s19  ;;  %368 = vrot.lane.b32.xlu0 %v333_v1, %s3067_s20  ;;  %s3095_s19 = smov 123   ;;  %s3096_s20 = smov 122  }
  0x1d   : > { %383 = vrot.lane.b32.xlu1 %v333_v1, %s3068_s21  ;;  %363 = vrot.lane.b32.xlu0 %v333_v1, %s3069_s22  ;;  %s3084_s21 = smov 90   ;;  %s3085_s22 = smov 91  }
  0x21   : > { %378 = vrot.lane.b32.xlu1 %v333_v1, %s3070_s23  ;;  %391 = vrot.lane.b32.xlu0 %v333_v1, %s3071_s24  ;;  %s3089_s23 = smov 118   ;;  %s3090_s24 = smov 116  }
  0x25   : > { %407 = vrot.lane.b32.xlu1 %v333_v1, %s3072_s25  ;;  %399 = vrot.lane.b32.xlu0 %v333_v1, %s3073_s26  ;;  %s3091_s25 = smov 106   ;;  %s3092_s26 = smov 107  }
  0x29   : > { %423 = vrot.lane.b32.xlu1 %v333_v1, %s3074_s27  ;;  %415 = vrot.lane.b32.xlu0 %v333_v1, %s3075_s28  ;;  %s3097_s27 = smov 119  }
  0x2d   : > { %433 = vrot.lane.b32.xlu0 %v333_v1, %s3076_s29  ;;  %439 = vrot.lane.b32.xlu1 %v333_v1, %s3077_s12  ;;  %v3212_v1 = vld [vmem:[%s3847_s1] sm:$0xff]  ;;  %s332_s12 = scalar_lea.vmem %s3855_s9, %s2447_s11 }
  0x83   : > { %v349_v2 = vpop.permute.xlu1 %348  ;;  %v339_v3 = vpop.permute.xlu0 %338 }
  0x84   : > { %342 = vst.msk [vmem:[#allocation2] sm:$0x7] %vm341_vm1, %v339_v3  ;;  %vm402_vm1 = vcmask 318464  }
  0x87   : > { %v354_v4 = vpop.permute.xlu1 %353  ;;  %v344_v5 = vpop.permute.xlu0 %343 }
  0x88   : > { %347 = vst.msk [vmem:[#allocation2] sm:$0x7] %vm346_vm2, %v344_v5  ;;  %vm405_vm2 = vcmask 707128  }
  0x89   : > { %352 = vst.msk [vmem:[#allocation2] sm:$0x7] %vm351_vm3, %v349_v2  ;;  %vm413_vm3 = vcmask 854728  }
  0x8a   : > { %357 = vst.msk [vmem:[#allocation2] sm:$0x7] %vm356_vm4, %v354_v4  ;;  %vm429_vm4 = vcmask 1043432  }
  0x8b   : > { %v359_v6 = vpop.permute.xlu1 %358  ;;  %v369_v7 = vpop.permute.xlu0 %368 }
  0x8c   : > { %362 = vst.msk [vmem:[#allocation2] sm:$0x7] %vm361_vm5, %v359_v6  ;;  %v370_v8 = vrot.slane %v369_v7, 4  ;;  %vm430_vm5 = vcmask 104452  }
  0x8e   : > { %v372_v11 = vsel %vm371_vm8, %v370_v8, %v369_v7  ;;  %vm421_vm8 = vcmask 1002328  }
  0x8f   : > { %v384_v9 = vpop.permute.xlu1 %383  ;;  %v364_v10 = vpop.permute.xlu0 %363 }
  0x90   : > { %v385_v12 = vrot.slane %v384_v9, 4  ;;  %367 = vst.msk [vmem:[#allocation2] sm:$0x7] %vm366_vm9, %v364_v10  ;;  %vm431_vm9 = vmor %vm430_vm5, %vm429_vm4  ;;  %vm589_vm4 = vcmask 1041408   ;;  %vm573_vm5 = vcmask 1045504  }
  0x91   : > { %377 = vst.msk [vmem:[#allocation2] sm:$0x77] %vm376_vm10, %v372_v11  ;;  %vm437_vm10 = vcmask 247928  }
  0x92   : > { %v387_v15 = vsel %vm386_vm11, %v384_v9, %v385_v12  ;;  %vm443_vm11 = vcmask 395528  }
  0x93   : > { %v379_v13 = vpop.permute.xlu1 %378  ;;  %v392_v14 = vpop.permute.xlu0 %391 }
  0x94   : > { %382 = vst.msk [vmem:[#allocation2 + $0x4] sm:$0x7] %vm381_vm12, %v379_v13  ;;  %v393_v16 = vrot.slane %v392_v14, 4  ;;  %vm600_vm12 = vcmask 228352  }
  0x95   : > { %390 = vst.msk [vmem:[#allocation2 + $0x4] sm:$0x7] %vm389_vm13, %v387_v15  ;;  %2559 = vmatprep.mubr.msk.f32.mxu1 %vm600_vm12, %v3212_v1  ;;  %vm462_vm13 = vcmask 1039360  }
  0x96   : > { %v395_v17 = vsel %vm394_vm14, %v392_v14, %v393_v16  ;;  %vm492_vm14 = vcmask 900096  }
  0x97   : > { %398 = vst.msk [vmem:[#allocation2 + $0x4] sm:$0x7] %vm397_vm15, %v395_v17  ;;  %v408_v18 = vpop.permute.xlu1 %407  ;;  %v400_v19 = vpop.permute.xlu0 %399  ;;  %vm577_vm15 = vcmask 1040384  }
  0x98   : > { %v409_v20 = vrot.slane %v408_v18, 4  ;;  %v401_v21 = vrot.slane %v400_v19, 4 }
  0x9a   : > { %v411_v22 = vsel %vm410_vm0, %v408_v18, %v409_v20  ;;  %v403_v23 = vsel %vm402_vm1, %v400_v19, %v401_v21  ;;  %vm521_vm0 = vcmask 883712   ;;  %vm506_vm1 = vcmask 891904  }
  0x9b   : > { %406 = vst.msk [vmem:[#allocation2 + $0x4] sm:$0x7] %vm405_vm2, %v403_v23  ;;  %v424_v24 = vpop.permute.xlu1 %423  ;;  %v416_v25 = vpop.permute.xlu0 %415  ;;  %vm569_vm2 = vcmask 1042432  }
  0x9c   : > { %v425_v26 = vrot.slane %v424_v24, 4  ;;  %414 = vst.msk [vmem:[#allocation2 + $0x4] sm:$0x7] %vm413_vm3, %v411_v22  ;;  %v417_v27 = vrot.slane %v416_v25, 4  ;;  %vm536_vm3 = vcmask 752640  }
  0x9e   : > { %v427_v28 = vsel %vm426_vm6, %v424_v24, %v425_v26  ;;  %v419_v29 = vsel %vm418_vm7, %v416_v25, %v417_v27  ;;  %vm477_vm6 = vcmask 1031168   ;;  %vm593_vm7 = vcmask 1044480  }
  0x9f   : > { %422 = vst.msk [vmem:[#allocation2 + $0x4] sm:$0x7] %vm421_vm8, %v419_v29  ;;  %v434_v30 = vpop.permute.xlu0 %433  ;;  %v440_v31 = vpop.permute.xlu1 %439  ;;  %vm581_vm8 = vcmask 1043456  }
  0xa0   : > { %432 = vst.msk [vmem:[#allocation2 + $0x4] sm:$0x77] %vm431_vm9, %v427_v28  ;;  %v435_v32 = vrot.slane %v434_v30, 4  ;;  %v441_v33 = vrot.slane %v440_v31, 4  ;;  %vm585_vm9 = vcmask 1046528  }
  0xa2   : > { %438 = vst.msk [vmem:[#allocation2 + $0x8] sm:$0x7] %vm437_vm10, %v435_v32  ;;  %vm563_vm10 = vcmask 736256  }
  0xa3   : > { %444 = vst.msk [vmem:[#allocation2 + $0x8] sm:$0x7] %vm443_vm11, %v441_v33  ;;  %vm551_vm11 = vcmask 744448  }
  0xa7   : > { %v3167_v34 = vld [vmem:[#allocation2] sm:$0x77] }
  0xa8   : > { %v483_v35 = vrot.slane %v3167_v34, 7  ;;  %v468_v36 = vrot.slane %v3167_v34, 2  ;;  %v3173_v37 = vcombine.high %v3167_v34, %v3167_v34  ;;  %v498_v39 = vcombine.low %v3167_v34, %v3167_v34 }
  0xa9   : > { %v453_v40 = vrot.slane %v3167_v34, 5  ;;  %v512_v43 = vrot.slane %v3167_v34, 1  ;;  %v527_v47 = vrot.slane %v3167_v34, 6  ;;  %v542_v2 = vrot.slane %v3167_v34, 3 }
  0xaa   : > { %486 = vrot.lane.b32.xlu0 %v483_v35, %s3078_s13  ;;  %471 = vrot.lane.b32.xlu1 %v468_v36, %s3079_s14  ;;  %v3177_v38 = vld [vmem:[#allocation2 + $0x8] sm:$0x7]  ;;  %v469_v41 = vrot.slane %v3173_v37, 2  ;;  %v454_v45 = vrot.slane %v3173_v37, 5  ;;  %v484_v48 = vrot.slane %v3173_v37, 7  ;;  %v513_v51 = vrot.slane %v3173_v37, 1 }
  0xab   : > { %v470_v42 = vrot.slane %v3177_v38, 2  ;;  %v455_v46 = vrot.slane %v3177_v38, 5  ;;  %v485_v50 = vrot.slane %v3177_v38, 7  ;;  %v514_v52 = vrot.slane %v3177_v38, 1 }
  0xac   : > { %v499_v53 = vcombine.low %v3177_v38, %v3177_v38  ;;  %v528_v56 = vrot.slane %v3173_v37, 6  ;;  %v529_v57 = vrot.slane %v3177_v38, 6  ;;  %v543_v60 = vrot.slane %v3173_v37, 3 }
  0xad   : > { %v2927_v44 = vpack.i.bf16 %v470_v42, %v469_v41  ;;  %v2937_v49 = vpack.i.bf16 %v455_v46, %v454_v45  ;;  %v2932_v54 = vpack.i.bf16 %v485_v50, %v484_v48  ;;  %v2952_v55 = vpack.i.bf16 %v514_v52, %v513_v51 }
  0xae   : > { %500 = vrot.lane.b32.xlu1 %v498_v39, %s3080_s15  ;;  %456 = vrot.lane.b32.xlu0 %v453_v40, %s3081_s16  ;;  %v2942_v58 = vpack.i.bf16 %v499_v53, %v3167_v34  ;;  %v2957_v59 = vpack.i.bf16 %v529_v57, %v528_v56  ;;  %v544_v61 = vrot.slane %v3177_v38, 3  ;;  %v2947_v62 = vpack.i.bf16 %v3177_v38, %v3173_v37 }
  0xb0   : > { %v2962_v63 = vpack.i.bf16 %v544_v61, %v543_v60 }
  0xb2   : > { %515 = vrot.lane.b32.xlu1 %v512_v43, %s3082_s17  ;;  %2928 = vrot.lane.b32.xlu0 %v2927_v44, %s3079_s14 }
  0xb6   : > { %530 = vrot.lane.b32.xlu1 %v527_v47, %s3083_s18  ;;  %2938 = vrot.lane.b32.xlu0 %v2937_v49, %s3081_s16 }
  0xba   : > { %2933 = vrot.lane.b32.xlu1 %v2932_v54, %s3078_s13  ;;  %2953 = vrot.lane.b32.xlu0 %v2952_v55, %s3082_s17 }
  0xbe   : > { %2943 = vrot.lane.b32.xlu1 %v2942_v58, %s3080_s15  ;;  %2958 = vrot.lane.b32.xlu0 %v2957_v59, %s3083_s18 }
  0xc2   : > { %2948 = vrot.lane.b32.xlu1 %v2947_v62, %s3084_s21  ;;  %2963 = vrot.lane.b32.xlu0 %v2962_v63, %s3085_s22 }
  0xc6   : > { %557 = vrot.lane.b32.xlu1 %v3167_v34, %s3084_s21  ;;  %545 = vrot.lane.b32.xlu0 %v542_v2, %s3085_s22 }
 0x11c   : > { %v472_v3 = vpop.permute.xlu1 %471  ;;  %v487_v4 = vpop.permute.xlu0 %486 }
 0x120   : > { %v501_v5 = vpop.permute.xlu1 %500  ;;  %v457_v6 = vpop.permute.xlu0 %456 }
 0x124   : > { %v516_v7 = vpop.permute.xlu1 %515  ;;  %v2929_v8 = vpop.permute.xlu0 %2928 }
 0x125   : > { %v2931_v13 = vunpack.i.h.bf16 %v2929_v8  ;;  %v2930_v14 = vunpack.i.l.bf16 %v2929_v8 }
 0x127   : > { %v479_v27 = vsel %vm477_vm6, %v2930_v14, %v2931_v13  ;;  %v478_v28 = vsel %vm477_vm6, %v472_v3, %v2930_v14  ;;  %vm1425_vm6 = vcmask 162816  }
 0x128   : > { %v531_v9 = vpop.permute.xlu1 %530  ;;  %v2939_v10 = vpop.permute.xlu0 %2938 }
 0x129   : > { %v2941_v11 = vunpack.i.h.bf16 %v2939_v10  ;;  %v2940_v12 = vunpack.i.l.bf16 %v2939_v10 }
 0x12b   : > { %v463_v15 = vsel %vm462_vm13, %v457_v6, %v2940_v12  ;;  %v464_v16 = vsel %vm462_vm13, %v2940_v12, %v2941_v11  ;;  %v572_v19 = vsel %vm569_vm2, %v3177_v38, %v2941_v11 }
 0x12c   : > { %v2934_v17 = vpop.permute.xlu1 %2933  ;;  %v2954_v18 = vpop.permute.xlu0 %2953  ;;  %v571_v22 = vsel %vm569_vm2, %v3173_v37, %v464_v16  ;;  %v570_v23 = vsel %vm569_vm2, %v3167_v34, %v463_v15  ;;  %v576_v32 = vsel %vm573_vm5, %v572_v19, %v2931_v13 }
 0x12d   : > { %v2936_v20 = vunpack.i.h.bf16 %v2934_v17  ;;  %v2935_v21 = vunpack.i.l.bf16 %v2934_v17  ;;  %v2956_v24 = vunpack.i.h.bf16 %v2954_v18  ;;  %v2955_v25 = vunpack.i.l.bf16 %v2954_v18 }
 0x12e   : > { %v575_v33 = vsel %vm573_vm5, %v571_v22, %v479_v27  ;;  %v574_v34 = vsel %vm573_vm5, %v570_v23, %v478_v28  ;;  %vm1280_vm5 = vcmask 269312  }
 0x12f   : > { %v494_v26 = vsel %vm492_vm14, %v2935_v21, %v2936_v20  ;;  %v493_v29 = vsel %vm492_vm14, %v487_v4, %v2935_v21  ;;  %v580_v39 = vsel %vm577_vm15, %v2931_v13, %v2936_v20  ;;  %v522_v40 = vsel %vm521_vm0, %v516_v7, %v2955_v25  ;;  %v448_v20 = vld [vmem:[%s3847_s1 + $0x8] sm:$0xff] }
 0x130   : > { %v2944_v30 = vpop.permute.xlu1 %2943  ;;  %v2959_v31 = vpop.permute.xlu0 %2958  ;;  %v523_v41 = vsel %vm521_vm0, %v2955_v25, %v2956_v24  ;;  %v579_v42 = vsel %vm577_vm15, %v479_v27, %v494_v26  ;;  %v578_v46 = vsel %vm577_vm15, %v478_v28, %v493_v29  ;;  %vm3086_vm0 = vmmov 1  }
 0x131   : > { %v2946_v35 = vunpack.i.h.bf16 %v2944_v30  ;;  %v2945_v36 = vunpack.i.l.bf16 %v2944_v30  ;;  %v2961_v37 = vunpack.i.h.bf16 %v2959_v31  ;;  %v2960_v38 = vunpack.i.l.bf16 %v2959_v31  ;;  %v858_v30 = vld [vmem:[%s3848_s2 + $0x80] sm:$0xff]  ;;  %v859_v31 = vld [vmem:[%s3848_s2 + $0x88] sm:$0xff] }
 0x133   : > { %v507_v43 = vsel %vm506_vm1, %v501_v5, %v2945_v36  ;;  %v537_v44 = vsel %vm536_vm3, %v531_v9, %v2960_v38  ;;  %v538_v45 = vsel %vm536_vm3, %v2960_v38, %v2961_v37  ;;  %v592_v47 = vsel %vm589_vm4, %v2956_v24, %v2961_v37  ;;  %v860_v37 = vld [vmem:[%s3848_s2 + $0x90] sm:$0xff]  ;;  %v861_v38 = vld [vmem:[%s3848_s2 + $0x98] sm:$0xff] }
 0x134   : > { %v2949_v48 = vpop.permute.xlu1 %2948  ;;  %v2964_v49 = vpop.permute.xlu0 %2963  ;;  %v584_v50 = vsel %vm581_vm8, %v580_v39, %v2946_v35  ;;  %v590_v51 = vsel %vm589_vm4, %v522_v40, %v537_v44  ;;  %v508_v52 = vsel %vm506_vm1, %v2945_v36, %v2946_v35  ;;  %v591_v59 = vsel %vm589_vm4, %v523_v41, %v538_v45  ;;  %vm3257_vm1 = vmpackc.low %vm581_vm8, %vm3086_vm0  ;;  %v843_v36 = vld [vmem:[%s3848_s2 + $0x8] sm:$0xff]  ;;  %v862_v44 = vld [vmem:[%s3848_s2 + $0xa0] sm:$0xff] }
 0x135   : > { %v2951_v53 = vunpack.i.h.bf16 %v2949_v48  ;;  %v2950_v54 = vunpack.i.l.bf16 %v2949_v48  ;;  %v2966_v55 = vunpack.i.h.bf16 %v2964_v49  ;;  %v2965_v56 = vunpack.i.l.bf16 %v2964_v49  ;;  %v863_v45 = vld [vmem:[%s3848_s2 + $0xa8] sm:$0xff]  ;;  %v846_v49 = vld [vmem:[%s3848_s2 + $0x20] sm:$0xff]  ;;  %v853_v9 = vld [vmem:[%s3848_s2 + $0x58] sm:$0xff] }
 0x136   : > { %v588_v57 = vsel %vm585_vm9, %v584_v50, %v2956_v24  ;;  %v583_v58 = vsel %vm581_vm8, %v579_v42, %v508_v52  ;;  %v582_v60 = vsel %vm581_vm8, %v578_v46, %v507_v43  ;;  %v2689_v35 = vpack.c.bf16 %v859_v31, %v858_v30  ;;  %v844_v42 = vld [vmem:[%s3848_s2 + $0x10] sm:$0xff]  ;;  %v845_v43 = vld [vmem:[%s3848_s2 + $0x18] sm:$0xff]  ;;  %v847_v50 = vld [vmem:[%s3848_s2 + $0x28] sm:$0xff] }
 0x137   : > { %v599_v61 = vsel %vm569_vm2, %v2951_v53, 1.0  ;;  %v596_v62 = vsel %vm593_vm7, %v592_v47, %v2966_v55  ;;  %v2679_v63 = vpack.c.bf16 %v588_v57, %v576_v32  ;;  %v565_v2 = vsel %vm563_vm10, %v2950_v54, %v2951_v53  ;;  %v842_v32 = vld [vmem:[%s3848_s2] sm:$0xff]  ;;  %v865_v52 = vld [vmem:[%s3848_s2 + $0xb8] sm:$0xff]  ;;  %v856_v30 = vld [vmem:[%s3848_s2 + $0x70] sm:$0xff] }
 0x138   : > { %v2683_v3 = vpack.c.bf16 %v599_v61, %v596_v62  ;;  %v558_v4 = vpop.permute.xlu1 %557  ;;  %v598_v5 = vsel %vm569_vm2, %v565_v2, 1.0  ;;  %v546_v6 = vpop.permute.xlu0 %545  ;;  %v553_v7 = vsel %vm551_vm11, %v2965_v56, %v2966_v55  ;;  %v587_v8 = vsel %vm585_vm9, %v583_v58, %v523_v41  ;;  %v848_v55 = vld [vmem:[%s3848_s2 + $0x30] sm:$0xff]  ;;  %v866_v57 = vld [vmem:[%s3848_s2 + $0xc0] sm:$0xff]  ;;  %v867_v58 = vld [vmem:[%s3848_s2 + $0xc8] sm:$0xff] }
 0x139   : > { %2680 = vmatprep.subr.bf16.mxu1 %v2679_v63  ;;  %v564_v10 = vsel %vm563_vm10, %v558_v4, %v2950_v54  ;;  %v552_v11 = vsel %vm551_vm11, %v546_v6, %v2965_v56  ;;  %v595_v12 = vsel %vm593_vm7, %v591_v59, %v553_v7  ;;  %v2669_v13 = vpack.c.bf16 %v587_v8, %v575_v33  ;;  %v849_v56 = vld [vmem:[%s3848_s2 + $0x38] sm:$0xff]  ;;  %v850_v61 = vld [vmem:[%s3848_s2 + $0x40] sm:$0xff]  ;;  %v851_v62 = vld [vmem:[%s3848_s2 + $0x48] sm:$0xff] }
 0x13a   : > { %v597_v14 = vsel %vm569_vm2, %v564_v10, 1.0  ;;  %v594_v15 = vsel %vm593_vm7, %v590_v51, %v552_v11  ;;  %2682 = vmatpush3.bf16.msra.mxu1 %v2679_v63  ;;  %v586_v16 = vsel %vm585_vm9, %v582_v60, %v522_v40  ;;  %v2673_v17 = vpack.c.bf16 %v598_v5, %v595_v12  ;;  %v864_v51 = vld [vmem:[%s3848_s2 + $0xb0] sm:$0xff]  ;;  %v874_v4 = vld [vmem:[%s3848_s2 + $0x100] sm:$0xff]  ;;  %v875_v6 = vld [vmem:[%s3848_s2 + $0x108] sm:$0x1f] }
 0x13b   : > { %2670 = vmatprep.subr.bf16.mxu0 %v2669_v13  ;;  %v2671_v18 = vpack.c.bf16 %v586_v16, %v574_v34  ;;  %2685 = vmatprep.subr.msk.bf16.mxu1 %vm3257_vm1, %v2683_v3  ;;  %v2676_v19 = vpack.c.bf16 %v597_v14, %v594_v15  ;;  %v2691_v40 = vpack.c.bf16 %v843_v36, %v842_v32  ;;  %v868_v2 = vld [vmem:[%s3848_s2 + $0xd0] sm:$0xff]  ;;  %v870_v11 = vld [vmem:[%s3848_s2 + $0xe0] sm:$0xff]  ;;  %v871_v12 = vld [vmem:[%s3848_s2 + $0xe8] sm:$0xff]  ;;  %vm876_vm2 = vcmask 105472  }
 0x13c   : > { %v2693_v41 = vpack.c.bf16 %v861_v38, %v860_v37  ;;  %v2695_v47 = vpack.c.bf16 %v845_v43, %v844_v42  ;;  %v2697_v48 = vpack.c.bf16 %v863_v45, %v862_v44  ;;  %v2699_v53 = vpack.c.bf16 %v847_v50, %v846_v49  ;;  %v852_v8 = vld [vmem:[%s3848_s2 + $0x50] sm:$0xff]  ;;  %v854_v14 = vld [vmem:[%s3848_s2 + $0x60] sm:$0xff]  ;;  %v855_v15 = vld [vmem:[%s3848_s2 + $0x68] sm:$0xff] }
 0x13d   : > { %2672 = vmatpush1.bf16.msra.mxu0 %v2671_v18  ;;  %v2701_v54 = vpack.c.bf16 %v865_v52, %v864_v51  ;;  %v2703_v59 = vpack.c.bf16 %v849_v56, %v848_v55  ;;  %v2705_v60 = vpack.c.bf16 %v867_v58, %v866_v57  ;;  %v2707_v63 = vpack.c.bf16 %v851_v62, %v850_v61  ;;  %v872_v18 = vld [vmem:[%s3848_s2 + $0xf0] sm:$0xff]  ;;  %v857_v31 = vld [vmem:[%s3848_s2 + $0x78] sm:$0xff] }
 0x13e   : > { %2675 = vmatprep.subr.msk.bf16.mxu0 %vm3257_vm1, %v2673_v17  ;;  %2688 = vmatpush3.bf16.msk.msra.mxu1 %vm3257_vm1, %v2683_v3  ;;  %v869_v3 = vld [vmem:[%s3848_s2 + $0xd8] sm:$0xff]  ;;  %v2721_v7 = vpack.c.bf16 %v875_v6, %v874_v4  ;;  %v2711_v10 = vpack.c.bf16 %v853_v9, %v852_v8  ;;  %v2713_v13 = vpack.c.bf16 %v871_v12, %v870_v11  ;;  %v1037_v11 = vld [vmem:[%s3849_s3 + $0x8] sm:$0xff]  ;;  %vm1185_vm3 = vcmask 564224  }
 0x13f   : > { %v2709_v5 = vpack.c.bf16 %v869_v3, %v868_v2  ;;  %v2715_v16 = vpack.c.bf16 %v855_v15, %v854_v14  ;;  %v2719_v32 = vpack.c.bf16 %v857_v31, %v856_v30 }
 0x141   : > { %2678 = vmatpush1.bf16.msk.msra.mxu0 %vm3257_vm1, %v2676_v19  ;;  %2560 = vmatmul.mubr.msk.f32.vlgmr.msra.gmra.mrb[0].mxu1 %vm600_vm12, %v448_v20  ;;  %v873_v19 = vld [vmem:[%s3848_s2 + $0xf8] sm:$0xff] }
 0x142   : > { %2690 = vmatprep.subr.bf16.mxu0 %v2689_v35 }
 0x144   : > { %2340 = vmatmul.mubr.msk.f32.vlgmr.msra.gmra.mrb[0].mxu0 %vm600_vm12, %v3212_v1 }
 0x145   : > { %686 = vmatprep.mubr.f32.mxu0 %v3061_v0  ;;  %2692 = vmatpush3.bf16.msra.mxu0 %v2691_v40 }
 0x146   : > { %2694 = vmatprep.subr.bf16.mxu0 %v2693_v41 }
 0x148   : > { %2341 = vmatmul.mubr.msk.f32.gmra.mrb[2].mxu0 %vm600_vm12, %v448_v20  ;;  %vm2722_vm12 = vmpackc.low %vm593_vm7, %vm3086_vm0 }
 0x149   : > { %2696 = vmatpush3.bf16.msra.mxu0 %v2695_v47  ;;  %2723 = vmatprep.subr.msk.bf16.mxu1 %vm2722_vm12, %v2721_v7 }
 0x14a   : > { %2698 = vmatprep.subr.bf16.mxu0 %v2697_v48  ;;  %2726 = vmatpush3.bf16.msk.msra.mxu1 %vm2722_vm12, %v2721_v7 }
 0x14d   : > { %2700 = vmatpush3.bf16.msra.mxu0 %v2699_v53 }
 0x14e   : > { %2702 = vmatprep.subr.bf16.mxu0 %v2701_v54 }
 0x151   : > { %2704 = vmatpush3.bf16.msra.mxu0 %v2703_v59 }
 0x152   : > { %2706 = vmatprep.subr.bf16.mxu0 %v2705_v60  ;;  %v3087_v60 = vmov 0.0|0.0  }
 0x155   : > { %2708 = vmatpush3.bf16.msra.mxu0 %v2707_v63 }
 0x156   : > { %2710 = vmatprep.subr.bf16.mxu0 %v2709_v5 }
 0x159   : > { %2712 = vmatpush3.bf16.msra.mxu0 %v2711_v10 }
 0x15a   : > { %2714 = vmatprep.subr.bf16.mxu0 %v2713_v13 }
 0x15d   : > { %2716 = vmatpush3.bf16.msra.mxu0 %v2715_v16 }
 0x214   : > { %v3283_v21 = vpop.f32.mrb[0].mxu1 }
 0x215   : > { %v3285_v22 = vpop.f32.mrb[1].mxu1  ;;  %v773_v25 = vmax.f32 %v3283_v21, 0.0 }
 0x216   : > { %v770_v23 = vmax.f32 %v3285_v22, 0.0 }
 0x217   : > { %v3288_v24 = vpop.f32.mrb[0].mxu0 }
 0x218   : > { %v768_v26 = vmax.f32 %v3288_v24, 0.0  ;;  %v3292_v27 = vpop.f32.mrb[1].mxu0  ;;  %784 = vrot.lane.b32.xlu1 %v770_v23, %s3081_s16 }
 0x219   : > { %v769_v1 = vmax.f32 %v3292_v27, 0.0 }
 0x21b   : > { %v2967_v28 = vpack.i.bf16 %v768_v26, %v769_v1  ;;  %v3302_v29 = vpop.f32.mrb[2].mxu0 }
 0x21c   : > { %v771_v33 = vmax.f32 %v3302_v29, 0.0  ;;  %v3314_v34 = vpop.f32.mrb[3].mxu0  ;;  %790 = vrot.lane.b32.xlu1 %v773_v25, %s3081_s16 }
 0x21d   : > { %v772_v39 = vmax.f32 %v3314_v34, 0.0  ;;  %2968 = vrot.lane.b32.xlu0 %v2967_v28, %s3081_s16  ;;  %v2717_v28 = vpack.c.bf16 %v873_v19, %v872_v18 }
 0x21f   : > { %v2972_v46 = vpack.i.bf16 %v771_v33, %v772_v39  ;;  %2718 = vmatprep.subr.bf16.mxu0 %v2717_v28 }
 0x220   : > { %2720 = vmatpush3.bf16.msra.mxu0 %v2719_v32 }
 0x221   : > { %2973 = vrot.lane.b32.xlu0 %v2972_v46, %s3081_s16  ;;  %2727 = vmatprep.subr.bf16.mxu0 %v3087_v60 }
 0x28a   : > { %v785_v17 = vpop.permute.xlu1 %784 }
 0x28b   : > { %v804_v20 = vmax.f32 %v770_v23, %v785_v17 }
 0x28d   : > { %818 = vrot.lane.b32.xlu1 %v804_v20, %s3078_s13 }
 0x28e   : > { %v791_v35 = vpop.permute.xlu1 %790 }
 0x28f   : > { %v2969_v36 = vpop.permute.xlu0 %2968  ;;  %v807_v22 = vmax.f32 %v773_v25, %v791_v35 }
 0x290   : > { %v2971_v23 = vunpack.i.h.bf16 %v2969_v36  ;;  %v2970_v37 = vunpack.i.l.bf16 %v2969_v36 }
 0x291   : > { %824 = vrot.lane.b32.xlu1 %v807_v22, %s3078_s13 }
 0x292   : > { %v792_v38 = vsel %vm462_vm13, %v2971_v23, %v2970_v37  ;;  %v793_v40 = vsel %vm462_vm13, %v2970_v37, %v785_v17 }
 0x293   : > { %v2974_v41 = vpop.permute.xlu0 %2973  ;;  %v802_v42 = vmax.f32 %v768_v26, %v792_v38  ;;  %v803_v43 = vmax.f32 %v769_v1, %v793_v40 }
 0x294   : > { %v2976_v44 = vunpack.i.h.bf16 %v2974_v41  ;;  %v2975_v45 = vunpack.i.l.bf16 %v2974_v41 }
 0x295   : > { %v2977_v46 = vpack.i.bf16 %v802_v42, %v803_v43 }
 0x296   : > { %v794_v21 = vsel %vm462_vm13, %v2976_v44, %v2975_v45  ;;  %v795_v25 = vsel %vm462_vm13, %v2975_v45, %v791_v35  ;;  %vm1088_vm13 = vcmask 138240  }
 0x297   : > { %2978 = vrot.lane.b32.xlu0 %v2977_v46, %s3078_s13  ;;  %v805_v47 = vmax.f32 %v771_v33, %v794_v21  ;;  %v806_v48 = vmax.f32 %v772_v39, %v795_v25 }
 0x299   : > { %v2982_v24 = vpack.i.bf16 %v805_v47, %v806_v48 }
 0x29b   : > { %2983 = vrot.lane.b32.xlu0 %v2982_v24, %s3078_s13  ;;  %s3088_s13 = smov 117  }
 0x2ff   : > { %v819_v26 = vpop.permute.xlu1 %818 }
 0x300   : > { %v838_v27 = vmax.f32 %v804_v20, %v819_v26 }
 0x302   : > { %2566 = vmatprep.mubr.msk.f32.mxu1 %vm876_vm2, %v838_v27  ;;  %v1036_v27 = vld [vmem:[%s3849_s3] sm:$0xff] }
 0x303   : > { %v825_v1 = vpop.permute.xlu1 %824 }
 0x304   : > { %v841_v49 = vmax.f32 %v807_v22, %v825_v1 }
 0x306   : > { %2567 = vmatmul.mubr.msk.f32.vlgmr.msra.gmra.mrb[2].mxu1 %vm876_vm2, %v841_v49  ;;  %v1176_v49 = vld [vmem:[%s3850_s4] sm:$0xff] }
 0x309   : > { %v2979_v50 = vpop.permute.xlu0 %2978 }
 0x30a   : > { %v2981_v51 = vunpack.i.h.bf16 %v2979_v50  ;;  %v2980_v52 = vunpack.i.l.bf16 %v2979_v50  ;;  %v1177_v50 = vld [vmem:[%s3850_s4 + $0x8] sm:$0xff] }
 0x30c   : > { %v826_v53 = vsel %vm492_vm14, %v2981_v51, %v2980_v52  ;;  %v827_v29 = vsel %vm492_vm14, %v2980_v52, %v819_v26  ;;  %v1178_v51 = vld [vmem:[%s3850_s4 + $0x10] sm:$0xff]  ;;  %v2755_v52 = vpack.c.bf16 %v1177_v50, %v1176_v49 }
 0x30d   : > { %v836_v33 = vmax.f32 %v802_v42, %v826_v53  ;;  %v2984_v34 = vpop.permute.xlu0 %2983  ;;  %v837_v39 = vmax.f32 %v803_v43, %v827_v29  ;;  %v1179_v53 = vld [vmem:[%s3850_s4 + $0x18] sm:$0xff] }
 0x30e   : > { %v2986_v54 = vunpack.i.h.bf16 %v2984_v34  ;;  %v2985_v55 = vunpack.i.l.bf16 %v2984_v34  ;;  %v2758_v29 = vpack.c.bf16 %v1179_v53, %v1178_v51  ;;  %v1181_v34 = vld [vmem:[%s3850_s4 + $0x28] sm:$0xff] }
 0x30f   : > { %950 = vmatprep.mubr.f32.mxu0 %v837_v39 }
 0x310   : > { %951 = vmatmul.mubr.f32.vlgmr.msra.gmra.mrb[4].mxu0 %v836_v33  ;;  %v829_v56 = vsel %vm492_vm14, %v2985_v55, %v825_v1  ;;  %v828_v57 = vsel %vm492_vm14, %v2986_v54, %v2985_v55  ;;  %v3093_v1 = vmov 1.0   ;;  %v1180_v33 = vld [vmem:[%s3850_s4 + $0x20] sm:$0xff]  ;;  %v1182_v55 = vld [vmem:[%s3850_s4 + $0x30] sm:$0xff]  ;;  %vm3094_vm14 = vmmov 0  }
 0x311   : > { %v840_v58 = vmax.f32 %v806_v48, %v829_v56  ;;  %v839_v59 = vmax.f32 %v805_v47, %v828_v57  ;;  %v2761_v39 = vpack.c.bf16 %v1181_v34, %v1180_v33  ;;  %v1183_v56 = vld [vmem:[%s3850_s4 + $0x38] sm:$0xff] }
 0x313   : > { %955 = vmatprep.mubr.f32.mxu0 %v840_v58 }
 0x314   : > { %956 = vmatmul.mubr.f32.gmra.mrb[6].mxu0 %v839_v59  ;;  %v2764_v59 = vpack.c.bf16 %v1183_v56, %v1182_v55 }
 0x315   : > { %2349 = vmatprep.mubr.msk.f32.mxu0 %vm1088_vm13, %v1037_v11  ;;  %v1263_v11 = vld [vmem:[%s3851_s5 + $0x8] sm:$0xff] }
 0x3d9   : > { %v2568_v61 = vpop.f32.mrb[2].mxu1 }
 0x3da   : > { %v1027_v62 = vpop.f32.mrb[3].mxu1 }
 0x3e3   : > { %v2487_v63 = vpop.f32.mrb[4].mxu0 }
 0x3e4   : > { %v2488_v2 = vpop.f32.mrb[5].mxu0 }
 0x3e5   : > { %v2489_v3 = vadd.f32 %v2488_v2, %v2487_v63 }
 0x3e7   : > { %v1028_v4 = vadd.f32 %v2489_v3, %v1027_v62  ;;  %v2490_v5 = vpop.f32.mrb[6].mxu0 }
 0x3e8   : > { %v2491_v6 = vpop.f32.mrb[7].mxu0 }
 0x3e9   : > { %v2492_v7 = vadd.f32 %v2491_v6, %v2490_v5 }
 0x3eb   : > { %v1033_v8 = vadd.f32 %v2568_v61, %v2492_v7  ;;  %v1184_v61 = vld [vmem:[%s3850_s4 + $0x40] sm:$0x1f] }
 0x3ed   : > { %v2992_v9 = vpack.i.bf16 %v1033_v8, %v1028_v4  ;;  %v2728_v10 = vpack.c.bf16 %v1033_v8, %v1028_v4 }
 0x3ef   : > { %2993 = vrot.lane.b32.xlu1 %v2992_v9, %s3079_s14  ;;  %2988 = vrot.lane.b32.xlu0 %v2992_v9, %s3081_s16 }
 0x3f0   : > { %2729 = vmatpush1.bf16.msra.mxu0 %v2728_v10 }
 0x3f1   : > { %2730 = vmatprep.subr.bf16.mxu0 %v3087_v60 }
 0x3f3   : > { %3003 = vrot.lane.b32.xlu1 %v2992_v9, %s3088_s13  ;;  %2998 = vrot.lane.b32.xlu0 %v2992_v9, %s3089_s23 }
 0x3f7   : > { %3013 = vrot.lane.b32.xlu1 %v2992_v9, %s3082_s17  ;;  %3008 = vrot.lane.b32.xlu0 %v2992_v9, %s3090_s24 }
 0x3fb   : > { %3023 = vrot.lane.b32.xlu1 %v2992_v9, %s3091_s25  ;;  %3018 = vrot.lane.b32.xlu0 %v2992_v9, %s3092_s26 }
 0x461   : > { %v2994_v12 = vpop.permute.xlu1 %2993  ;;  %v2989_v13 = vpop.permute.xlu0 %2988 }
 0x462   : > { %v2991_v14 = vunpack.i.h.bf16 %v2989_v13  ;;  %v2990_v15 = vunpack.i.l.bf16 %v2989_v13  ;;  %v2996_v16 = vunpack.i.h.bf16 %v2994_v12  ;;  %v2995_v17 = vunpack.i.l.bf16 %v2994_v12  ;;  %v1264_v12 = vld [vmem:[%s3851_s5 + $0x10] sm:$0xff]  ;;  %v1265_v13 = vld [vmem:[%s3851_s5 + $0x18] sm:$0xff] }
 0x464   : > { %v2731_v18 = vpack.c.bf16 %v2991_v14, %v2990_v15  ;;  %v2734_v20 = vpack.c.bf16 %v2996_v16, %v2995_v17  ;;  %v1266_v14 = vld [vmem:[%s3851_s5 + $0x20] sm:$0xff]  ;;  %v1267_v15 = vld [vmem:[%s3851_s5 + $0x28] sm:$0xff]  ;;  %v1268_v16 = vld [vmem:[%s3851_s5 + $0x30] sm:$0xff] }
 0x465   : > { %v2999_v19 = vpop.permute.xlu0 %2998  ;;  %v3004_v31 = vpop.permute.xlu1 %3003  ;;  %v1269_v17 = vld [vmem:[%s3851_s5 + $0x38] sm:$0xff] }
 0x466   : > { %2732 = vmatpush1.bf16.msra.mxu0 %v2731_v18  ;;  %v3001_v28 = vunpack.i.h.bf16 %v2999_v19  ;;  %v3000_v30 = vunpack.i.l.bf16 %v2999_v19  ;;  %v3006_v32 = vunpack.i.h.bf16 %v3004_v31  ;;  %v3005_v35 = vunpack.i.l.bf16 %v3004_v31  ;;  %v2361_v18 = vld [vmem:[%s3852_s6 + $0x18] sm:$0xff]  ;;  %v2362_v19 = vld [vmem:[%s3852_s6 + $0x20] sm:$0xff]  ;;  %v1419_v31 = vld [vmem:[%s3852_s6 + $0x8] sm:$0xff] }
 0x467   : > { %2733 = vmatprep.subr.bf16.mxu0 %v3087_v60 }
 0x468   : > { %v2737_v36 = vpack.c.bf16 %v3001_v28, %v3000_v30  ;;  %v2740_v23 = vpack.c.bf16 %v3006_v32, %v3005_v35  ;;  %v2363_v28 = vld [vmem:[%s3852_s6 + $0x28] sm:$0xf]  ;;  %v1418_v30 = vld [vmem:[%s3852_s6] sm:$0xff] }
 0x469   : > { %v3009_v22 = vpop.permute.xlu0 %3008  ;;  %v3014_v40 = vpop.permute.xlu1 %3013  ;;  %v2778_v32 = vpack.c.bf16 %v1419_v31, %v1418_v30  ;;  %v2400_v30 = vld [vmem:[%s3854_s8 + $0xf8] sm:$0xff]  ;;  %v2402_v31 = vld [vmem:[%s3854_s8 + $0x108] sm:$0xff] }
 0x46a   : > { %2735 = vmatpush1.bf16.msra.mxu0 %v2734_v20  ;;  %v3011_v37 = vunpack.i.h.bf16 %v3009_v22  ;;  %v3010_v38 = vunpack.i.l.bf16 %v3009_v22  ;;  %v3016_v41 = vunpack.i.h.bf16 %v3014_v40  ;;  %v3015_v42 = vunpack.i.l.bf16 %v3014_v40 }
 0x46b   : > { %2736 = vmatprep.subr.bf16.mxu0 %v3087_v60  ;;  %v2774_v20 = vpack.c.bf16 %v2362_v19, %v2361_v18  ;;  %v2398_v18 = vld [vmem:[%s3854_s8 + $0xe8] sm:$0xff]  ;;  %v2395_v19 = vld [vmem:[%s3854_s8 + $0xd0] sm:$0xff] }
 0x46c   : > { %v2743_v43 = vpack.c.bf16 %v3011_v37, %v3010_v38  ;;  %v2746_v45 = vpack.c.bf16 %v3016_v41, %v3015_v42  ;;  %v1420_v41 = vld [vmem:[%s3852_s6 + $0x10] sm:$0xf] }
 0x46d   : > { %v3019_v44 = vpop.permute.xlu0 %3018  ;;  %v3024_v25 = vpop.permute.xlu1 %3023  ;;  %v2370_v42 = vld [vmem:[%s3852_s6 + $0x30] sm:$0xff] }
 0x46e   : > { %2738 = vmatpush1.bf16.msra.mxu0 %v2737_v36  ;;  %v3021_v46 = vunpack.i.h.bf16 %v3019_v44  ;;  %v3020_v21 = vunpack.i.l.bf16 %v3019_v44  ;;  %v3026_v47 = vunpack.i.h.bf16 %v3024_v25  ;;  %v3025_v48 = vunpack.i.l.bf16 %v3024_v25 }
 0x46f   : > { %2739 = vmatprep.subr.bf16.mxu0 %v3087_v60 }
 0x470   : > { %v2749_v24 = vpack.c.bf16 %v3021_v46, %v3020_v21  ;;  %v2752_v26 = vpack.c.bf16 %v3026_v47, %v3025_v48 }
 0x472   : > { %2741 = vmatpush1.bf16.msra.mxu0 %v2740_v23 }
 0x473   : > { %2742 = vmatprep.subr.bf16.mxu0 %v3087_v60 }
 0x476   : > { %2744 = vmatpush1.bf16.msra.mxu0 %v2743_v43  ;;  %v2371_v43 = vld [vmem:[%s3852_s6 + $0x38] sm:$0xff] }
 0x477   : > { %2745 = vmatprep.subr.bf16.mxu0 %v3087_v60  ;;  %v2782_v46 = vpack.c.bf16 %v2371_v43, %v2370_v42 }
 0x47a   : > { %2747 = vmatpush1.bf16.msra.mxu0 %v2746_v45 }
 0x47b   : > { %2748 = vmatprep.subr.bf16.mxu0 %v3087_v60 }
 0x47e   : > { %2750 = vmatpush1.bf16.msra.mxu0 %v2749_v24  ;;  %v2372_v24 = vld [vmem:[%s3852_s6 + $0x40] sm:$0xf] }
 0x47f   : > { %2751 = vmatprep.subr.bf16.mxu0 %v3087_v60 }
 0x482   : > { %2753 = vmatpush1.bf16.msra.mxu0 %v2752_v26  ;;  %v2376_v26 = vld [vmem:[%s3852_s6 + $0x48] sm:$0xff] }
 0x483   : > { %1131 = vmatprep.subr.mxu0 %v3061_v0 }
 0x486   : > { %2348 = vmatpush1.msk.msra.mxu0 %vm577_vm15, %v3093_v1 }
 0x487   : > { %1160 = vmatmul.mubr.f32.vlgmr.msra.gmra.mrb[8].mxu0 %v1036_v27  ;;  %2754 = vmatprep.subr.bf16.mxu0 %v3087_v60  ;;  %v2377_v27 = vld [vmem:[%s3852_s6 + $0x50] sm:$0xff] }
 0x488   : > { %2756 = vmatpush3.bf16.msra.mxu0 %v2755_v52  ;;  %2587 = vmatprep.mubr.msk.f32.mxu0 %vm3094_vm14, %v3061_v0  ;;  %v2786_v49 = vpack.c.bf16 %v2377_v27, %v2376_v26  ;;  %v2378_v52 = vld [vmem:[%s3852_s6 + $0x58] sm:$0xf]  ;;  %v1892_v26 = vld [vmem:[%s3854_s8 + $0x10] sm:$0xff]  ;;  %v1895_v27 = vld [vmem:[%s3854_s8 + $0x28] sm:$0xff] }
 0x489   : > { %2757 = vmatprep.subr.bf16.mxu0 %v3087_v60 }
 0x48c   : > { %2759 = vmatpush3.bf16.msra.mxu0 %v2758_v29 }
 0x48d   : > { %2760 = vmatprep.subr.bf16.mxu0 %v3087_v60 }
 0x490   : > { %2762 = vmatpush3.bf16.msra.mxu0 %v2761_v39 }
 0x491   : > { %2763 = vmatprep.subr.bf16.mxu0 %v3087_v60  ;;  %v1262_v60 = vld [vmem:[%s3851_s5] sm:$0xff] }
 0x492   : > { %2600 = vmatprep.mubr.msk.f32.mxu1 %vm1280_vm5, %v1262_v60 }
 0x494   : > { %2765 = vmatpush3.bf16.msra.mxu0 %v2764_v59 }
 0x495   : > { %2585 = vmatprep.subr.mxu0 %v3061_v0 }
 0x498   : > { %2586 = vmatpush3.msk.msra.mxu0 %vm593_vm7, %v1184_v61  ;;  %vm1796_vm7 = vcmask 531456  }
 0x499   : > { %2775 = vmatprep.subr.bf16.mxu0 %v2774_v20 }
 0x55a   : > { %v1161_v54 = vpop.f32.mrb[8].mxu0 }
 0x55b   : > { %v1165_v57 = vmax.f32 %v1161_v54, 0.0  ;;  %v1163_v58 = vpop.f32.mrb[9].mxu0  ;;  %v1774_v54 = vld [vmem:[%s3853_s7] sm:$0xff] }
 0x55d   : > { %1167 = vrot.lane.b32.xlu0 %v1165_v57, %s3081_s16 }
 0x5cf   : > { %v1168_v62 = vpop.permute.xlu0 %1167 }
 0x5d0   : > { %v1170_v63 = vmax.f32 %v1165_v57, %v1168_v62 }
 0x5d2   : > { %1172 = vrot.lane.b32.xlu1 %v1170_v63, %s3089_s23 }
 0x644   : > { %v1173_v2 = vpop.permute.xlu1 %1172 }
 0x645   : > { %v1175_v3 = vmax.f32 %v1170_v63, %v1173_v2 }
 0x647   : > { %2588 = vmatmul.mubr.msk.f32.vlgmr.msra.gmra.mrb[10].mxu0 %vm1185_vm3, %v1175_v3 }
 0x648   : > { %2777 = vmatpush3.bf16.msra.mxu0 %v2774_v20 }
 0x649   : > { %2616 = vmatprep.subr.msk.mxu0 %vm581_vm8, %v2363_v28 }
 0x64c   : > { %2617 = vmatpush3.msk.msra.mxu0 %vm581_vm8, %v2363_v28  ;;  %v2397_v28 = vld [vmem:[%s3854_s8 + $0xe0] sm:$0xff] }
 0x64d   : > { %2779 = vmatprep.subr.bf16.mxu0 %v2778_v32 }
 0x71a   : > { %v1258_v4 = vpop.f32.mrb[10].mxu0 }
 0x71b   : > { %1274 = vrot.lane.b32.xlu1 %v1258_v4, %s3095_s19  ;;  %1271 = vrot.lane.b32.xlu0 %v1258_v4, %s3081_s16  ;;  %v2589_v5 = vpop.f32.mrb[11].mxu0 }
 0x71c   : > { %v1775_v5 = vld [vmem:[%s3853_s7 + $0x8] sm:$0xf] }
 0x71f   : > { %1277 = vrot.lane.b32.xlu0 %v1258_v4, %s3096_s20 }
 0x78d   : > { %v1272_v6 = vpop.permute.xlu0 %1271  ;;  %v1275_v8 = vpop.permute.xlu1 %1274 }
 0x78e   : > { %v2766_v7 = vpack.c.bf16 %v1272_v6, %v1258_v4  ;;  %v2388_v6 = vld [vmem:[%s3854_s8 + $0x98] sm:$0xff] }
 0x790   : > { %2767 = vmatprep.subr.bf16.mxu1 %v2766_v7 }
 0x791   : > { %2769 = vmatpush3.bf16.msra.mxu1 %v2766_v7  ;;  %v1278_v9 = vpop.permute.xlu0 %1277  ;;  %v2390_v7 = vld [vmem:[%s3854_s8 + $0xa8] sm:$0xff] }
 0x792   : > { %v2770_v10 = vpack.c.bf16 %v1278_v9, %v1275_v8  ;;  %v2806_v8 = vpack.c.bf16 %v2390_v7, %v2388_v6  ;;  %v2387_v9 = vld [vmem:[%s3854_s8 + $0x90] sm:$0xff]  ;;  %v1907_v7 = vld [vmem:[%s3854_s8 + $0x88] sm:$0xff] }
 0x794   : > { %2771 = vmatprep.subr.bf16.mxu1 %v2770_v10 }
 0x795   : > { %2773 = vmatpush3.bf16.msra.mxu1 %v2770_v10 }
 0x796   : > { %2598 = vmatprep.subr.msk.mxu1 %vm577_vm15, %v3093_v1 }
 0x799   : > { %2599 = vmatpush3.msk.msra.mxu1 %vm577_vm15, %v3093_v1 }
 0x79a   : > { %2601 = vmatmul.mubr.msk.f32.vlgmr.msra.gmra.mrb[4].mxu1 %vm1280_vm5, %v1263_v11  ;;  %v2392_v11 = vld [vmem:[%s3854_s8 + $0xb8] sm:$0xff] }
 0x79b   : > { %2603 = vmatprep.mubr.msk.f32.mxu1 %vm1280_vm5, %v1264_v12  ;;  %v2394_v12 = vld [vmem:[%s3854_s8 + $0xc8] sm:$0xff] }
 0x79e   : > { %2604 = vmatmul.mubr.msk.f32.gmra.mrb[6].mxu1 %vm1280_vm5, %v1265_v13  ;;  %v2810_v13 = vpack.c.bf16 %v2394_v12, %v2392_v11  ;;  %v2412_v11 = vld [vmem:[%s3854_s8 + $0x148] sm:$0xff]  ;;  %v2414_v12 = vld [vmem:[%s3854_s8 + $0x158] sm:$0xff] }
 0x79f   : > { %2606 = vmatprep.mubr.msk.f32.mxu1 %vm1280_vm5, %v1266_v14  ;;  %v2391_v14 = vld [vmem:[%s3854_s8 + $0xb0] sm:$0xff] }
 0x7a2   : > { %2607 = vmatmul.mubr.msk.f32.gmra.mrb[8].mxu1 %vm1280_vm5, %v1267_v15  ;;  %v2393_v15 = vld [vmem:[%s3854_s8 + $0xc0] sm:$0xff] }
 0x7a3   : > { %2609 = vmatprep.mubr.msk.f32.mxu1 %vm1280_vm5, %v1268_v16  ;;  %v2812_v16 = vpack.c.bf16 %v2393_v15, %v2391_v14 }
 0x7a6   : > { %2610 = vmatmul.mubr.msk.f32.gmra.mrb[10].mxu1 %vm1280_vm5, %v1269_v17  ;;  %v2396_v17 = vld [vmem:[%s3854_s8 + $0xd8] sm:$0xff] }
 0x7a7   : > { %2666 = vmatprep.mubr.msk.f32.mxu1 %vm1796_vm7, %v1774_v54  ;;  %v2814_v20 = vpack.c.bf16 %v2398_v18, %v2396_v17  ;;  %v2411_v17 = vld [vmem:[%s3854_s8 + $0x140] sm:$0xff]  ;;  %v2413_v18 = vld [vmem:[%s3854_s8 + $0x150] sm:$0xff] }
 0x86d   : > { %v2602_v35 = vpop.f32.mrb[4].mxu1 }
 0x86e   : > { %v1371_v36 = vpop.f32.mrb[5].mxu1  ;;  %v1411_v48 = vmax.f32 %v2602_v35, 0.0  ;;  %v2818_v35 = vpack.c.bf16 %v2402_v31, %v2400_v30  ;;  %v2415_v31 = vld [vmem:[%s3854_s8 + $0x160] sm:$0xff] }
 0x86f   : > { %v1410_v40 = vmax.f32 %v1371_v36, 0.0  ;;  %v2399_v36 = vld [vmem:[%s3854_s8 + $0xf0] sm:$0xff] }
 0x871   : > { %v2605_v22 = vpop.f32.mrb[6].mxu1 }
 0x872   : > { %v1381_v23 = vpop.f32.mrb[7].mxu1  ;;  %v1413_v38 = vmax.f32 %v2605_v22, 0.0  ;;  %v2401_v22 = vld [vmem:[%s3854_s8 + $0x100] sm:$0xff] }
 0x873   : > { %v1412_v37 = vmax.f32 %v1381_v23, 0.0  ;;  %v2820_v23 = vpack.c.bf16 %v2401_v22, %v2399_v36  ;;  %v2422_v36 = vld [vmem:[%s3854_s8 + $0x198] sm:$0xff] }
 0x875   : > { %2618 = vmatprep.mubr.msk.f32.mxu0 %vm1425_vm6, %v1412_v37  ;;  %v2608_v44 = vpop.f32.mrb[8].mxu1  ;;  %v2404_v37 = vld [vmem:[%s3854_s8 + $0x118] sm:$0xff] }
 0x876   : > { %2619 = vmatmul.mubr.msk.f32.vlgmr.msra.gmra.mrb[12].mxu0 %vm1425_vm6, %v1413_v38  ;;  %v1391_v45 = vpop.f32.mrb[9].mxu1  ;;  %v1415_v51 = vmax.f32 %v2608_v44, 0.0  ;;  %v1891_v38 = vld [vmem:[%s3854_s8 + $0x8] sm:$0xff] }
 0x877   : > { %2627 = vmatprep.mubr.msk.f32.mxu0 %vm1425_vm6, %v1410_v40  ;;  %2781 = vmatpush3.bf16.msra.mxu0 %v2778_v32  ;;  %v1414_v47 = vmax.f32 %v1391_v45, 0.0  ;;  %v2816_v32 = vpack.c.bf16 %v2397_v28, %v2395_v19  ;;  %v1893_v40 = vld [vmem:[%s3854_s8 + $0x18] sm:$0xff]  ;;  %v2416_v19 = vld [vmem:[%s3854_s8 + $0x168] sm:$0xff]  ;;  %v2844_v28 = vpack.c.bf16 %v2413_v18, %v2411_v17 }
 0x878   : > { %2625 = vmatprep.subr.msk.mxu0 %vm581_vm8, %v1420_v41  ;;  %v2822_v42 = vpack.c.bf16 %v1893_v40, %v1891_v38  ;;  %v2421_v38 = vld [vmem:[%s3854_s8 + $0x190] sm:$0xff] }
 0x879   : > { %v2611_v21 = vpop.f32.mrb[10].mxu1 }
 0x87a   : > { %v1401_v25 = vpop.f32.mrb[11].mxu1  ;;  %v1417_v53 = vmax.f32 %v2611_v21, 0.0 }
 0x87b   : > { %2626 = vmatpush3.msk.msra.mxu0 %vm581_vm8, %v1420_v41  ;;  %v1416_v50 = vmax.f32 %v1401_v25, 0.0  ;;  %v2403_v41 = vld [vmem:[%s3854_s8 + $0x110] sm:$0xff] }
 0x87c   : > { %2783 = vmatprep.subr.bf16.mxu0 %v2782_v46 }
 0x87e   : > { %2628 = vmatmul.mubr.msk.f32.vlgmr.msra.gmra.mrb[12].mxu0 %vm1425_vm6, %v1411_v48 }
 0x87f   : > { %2785 = vmatpush3.bf16.msra.mxu0 %v2782_v46  ;;  %2636 = vmatprep.mubr.msk.f32.mxu0 %vm1425_vm6, %v1414_v47 }
 0x880   : > { %2634 = vmatprep.subr.msk.mxu0 %vm581_vm8, %v2372_v24 }
 0x883   : > { %2635 = vmatpush3.msk.msra.mxu0 %vm581_vm8, %v2372_v24  ;;  %v1890_v24 = vld [vmem:[%s3854_s8] sm:$0xff] }
 0x884   : > { %2787 = vmatprep.subr.bf16.mxu0 %v2786_v49 }
 0x886   : > { %2637 = vmatmul.mubr.msk.f32.vlgmr.msra.gmra.mrb[12].mxu0 %vm1425_vm6, %v1415_v51 }
 0x887   : > { %2789 = vmatpush3.bf16.msra.mxu0 %v2786_v49  ;;  %2645 = vmatprep.mubr.msk.f32.mxu0 %vm1425_vm6, %v1416_v50  ;;  %v1897_v49 = vld [vmem:[%s3854_s8 + $0x38] sm:$0xff] }
 0x888   : > { %2643 = vmatprep.subr.msk.mxu0 %vm581_vm8, %v2378_v52 }
 0x88b   : > { %2644 = vmatpush3.msk.msra.mxu0 %vm581_vm8, %v2378_v52  ;;  %v2824_v52 = vpack.c.bf16 %v1892_v26, %v1890_v24  ;;  %v2430_v26 = vld [vmem:[%s3854_s8 + $0x1d0] sm:$0xff] }
 0x88e   : > { %2646 = vmatmul.mubr.msk.f32.vlgmr.msra.gmra.mrb[12].mxu0 %vm1425_vm6, %v1417_v53 }
 0x961   : > { %v2647_v29 = vpop.f32.mrb[12].mxu0 }
 0x962   : > { %v1763_v33 = vpop.f32.mrb[13].mxu0 }
 0x963   : > { %v3037_v34 = vpack.i.bf16 %v2647_v29, %v1763_v33  ;;  %v2790_v39 = vpack.c.bf16 %v2647_v29, %v1763_v33  ;;  %v2826_v33 = vpack.c.bf16 %v1897_v49, %v1895_v27  ;;  %v2432_v27 = vld [vmem:[%s3854_s8 + $0x1e0] sm:$0xff]  ;;  %v2435_v49 = vld [vmem:[%s3854_s8 + $0x1f8] sm:$0xff] }
 0x965   : > { %3033 = vrot.lane.b32.xlu0 %v3037_v34, %s3097_s27  ;;  %3028 = vrot.lane.b32.xlu1 %v3037_v34, %s3081_s16 }
 0x966   : > { %2791 = vmatprep.subr.bf16.mxu1 %v2790_v39 }
 0x967   : > { %2793 = vmatpush3.bf16.msra.mxu1 %v2790_v39  ;;  %v1896_v39 = vld [vmem:[%s3854_s8 + $0x30] sm:$0xff] }
 0x969   : > { %3038 = vrot.lane.b32.xlu1 %v3037_v34, %s3089_s23  ;;  %v1894_v34 = vld [vmem:[%s3854_s8 + $0x20] sm:$0xff] }
 0x9d7   : > { %v3034_v55 = vpop.permute.xlu0 %3033  ;;  %v3029_v56 = vpop.permute.xlu1 %3028 }
 0x9d8   : > { %v3036_v57 = vunpack.i.h.bf16 %v3034_v55  ;;  %v3035_v58 = vunpack.i.l.bf16 %v3034_v55  ;;  %v3031_v59 = vunpack.i.h.bf16 %v3029_v56  ;;  %v3030_v61 = vunpack.i.l.bf16 %v3029_v56  ;;  %v1899_v55 = vld [vmem:[%s3854_s8 + $0x48] sm:$0xff]  ;;  %v1901_v56 = vld [vmem:[%s3854_s8 + $0x58] sm:$0xff] }
 0x9da   : > { %v2794_v62 = vpack.c.bf16 %v3031_v59, %v3030_v61  ;;  %v2798_v2 = vpack.c.bf16 %v3036_v57, %v3035_v58  ;;  %v2828_v58 = vpack.c.bf16 %v1896_v39, %v1894_v34  ;;  %v2830_v59 = vpack.c.bf16 %v1901_v56, %v1899_v55  ;;  %v1898_v61 = vld [vmem:[%s3854_s8 + $0x40] sm:$0xff]  ;;  %v2439_v34 = vld [vmem:[%s3854_s8 + $0x218] sm:$0xff]  ;;  %v2441_v39 = vld [vmem:[%s3854_s8 + $0x228] sm:$0xff] }
 0x9db   : > { %v3039_v63 = vpop.permute.xlu1 %3038  ;;  %v2438_v55 = vld [vmem:[%s3854_s8 + $0x210] sm:$0xff]  ;;  %v2440_v56 = vld [vmem:[%s3854_s8 + $0x220] sm:$0xff] }
 0x9dc   : > { %v3041_v3 = vunpack.i.h.bf16 %v3039_v63  ;;  %v3040_v60 = vunpack.i.l.bf16 %v3039_v63  ;;  %2795 = vmatprep.subr.bf16.mxu1 %v2794_v62  ;;  %v1903_v63 = vld [vmem:[%s3854_s8 + $0x68] sm:$0xff] }
 0x9dd   : > { %2797 = vmatpush3.bf16.msra.mxu1 %v2794_v62  ;;  %v1900_v62 = vld [vmem:[%s3854_s8 + $0x50] sm:$0xff] }
 0x9de   : > { %2799 = vmatprep.subr.bf16.mxu1 %v2798_v2  ;;  %v2802_v4 = vpack.c.bf16 %v3041_v3, %v3040_v60  ;;  %v2832_v3 = vpack.c.bf16 %v1900_v62, %v1898_v61 }
 0x9e1   : > { %2801 = vmatpush3.bf16.msra.mxu1 %v2798_v2  ;;  %v1905_v2 = vld [vmem:[%s3854_s8 + $0x78] sm:$0xff] }
 0x9e2   : > { %2803 = vmatprep.subr.bf16.mxu1 %v2802_v4  ;;  %v2834_v60 = vpack.c.bf16 %v1905_v2, %v1903_v63 }
 0x9e5   : > { %2805 = vmatpush3.bf16.msra.mxu1 %v2802_v4  ;;  %v1902_v4 = vld [vmem:[%s3854_s8 + $0x60] sm:$0xff] }
 0x9e6   : > { %2664 = vmatprep.subr.msk.mxu1 %vm577_vm15, %v3093_v1 }
 0x9e9   : > { %2665 = vmatpush3.msk.msra.mxu1 %vm577_vm15, %v3093_v1  ;;  %v2389_v1 = vld [vmem:[%s3854_s8 + $0xa0] sm:$0xff]  ;;  %vm1929_vm15 = vcmask 588800  }
 0x9ea   : > { %2667 = vmatmul.mubr.msk.f32.vlgmr.msra.gmra.mrb[12].mxu1 %vm1796_vm7, %v1775_v5  ;;  %v2808_v10 = vpack.c.bf16 %v2389_v1, %v2387_v9  ;;  %2807 = vmatprep.subr.bf16.mxu1 %v2806_v8  ;;  %v1904_v5 = vld [vmem:[%s3854_s8 + $0x70] sm:$0xff]  ;;  %v2408_v8 = vld [vmem:[%s3854_s8 + $0x128] sm:$0xff]  ;;  %v2410_v9 = vld [vmem:[%s3854_s8 + $0x138] sm:$0xff] }
 0x9eb   : > { %1996 = vmatprep.mubr.f32.mxu1 %v3061_v0  ;;  %v2836_v6 = vpack.c.bf16 %v1904_v5, %v1902_v4  ;;  %v2407_v1 = vld [vmem:[%s3854_s8 + $0x120] sm:$0xff]  ;;  %v2838_v14 = vpack.c.bf16 %v2410_v9, %v2408_v8 }
 0x9ec   : > { %2809 = vmatpush1.bf16.msra.mxu1 %v2808_v10  ;;  %v2409_v10 = vld [vmem:[%s3854_s8 + $0x130] sm:$0xff] }
 0x9ed   : > { %2811 = vmatprep.subr.bf16.mxu1 %v2810_v13  ;;  %v1906_v13 = vld [vmem:[%s3854_s8 + $0x80] sm:$0xff]  ;;  %v2840_v15 = vpack.c.bf16 %v2409_v10, %v2407_v1 }
 0x9f0   : > { %2813 = vmatpush1.bf16.msra.mxu1 %v2812_v16  ;;  %v2842_v16 = vpack.c.bf16 %v2414_v12, %v2412_v11 }
 0x9f1   : > { %2815 = vmatprep.subr.bf16.mxu1 %v2814_v20  ;;  %v2418_v20 = vld [vmem:[%s3854_s8 + $0x178] sm:$0xff] }
 0x9f2   : > { %v2846_v30 = vpack.c.bf16 %v2418_v20, %v2416_v19 }
 0x9f4   : > { %2817 = vmatpush1.bf16.msra.mxu1 %v2816_v32  ;;  %v2417_v32 = vld [vmem:[%s3854_s8 + $0x170] sm:$0xff] }
 0x9f5   : > { %2819 = vmatprep.subr.bf16.mxu1 %v2818_v35  ;;  %v2420_v35 = vld [vmem:[%s3854_s8 + $0x188] sm:$0xff]  ;;  %v2848_v22 = vpack.c.bf16 %v2417_v32, %v2415_v31 }
 0x9f8   : > { %2821 = vmatpush1.bf16.msra.mxu1 %v2820_v23  ;;  %v2850_v23 = vpack.c.bf16 %v2422_v36, %v2420_v35 }
 0x9f9   : > { %1948 = vmatprep.subr.mxu1 %v2404_v37  ;;  %v2419_v37 = vld [vmem:[%s3854_s8 + $0x180] sm:$0xff] }
 0x9fa   : > { %v2852_v40 = vpack.c.bf16 %v2421_v38, %v2419_v37 }
 0x9fc   : > { %1949 = vmatpush1.msra.mxu1 %v2403_v41  ;;  %v2424_v41 = vld [vmem:[%s3854_s8 + $0x1a8] sm:$0xff] }
 0x9fd   : > { %2823 = vmatprep.subr.bf16.mxu1 %v2822_v42  ;;  %v2427_v42 = vld [vmem:[%s3854_s8 + $0x1b8] sm:$0xff] }
 0xabd   : > { %v2668_v43 = vpop.f32.mrb[12].mxu1 }
 0xabe   : > { %v2386_v44 = vmul.f32 -1.442695, %v2668_v43  ;;  %v1869_v45 = vpop.f32.mrb[13].mxu1  ;;  %v2429_v43 = vld [vmem:[%s3854_s8 + $0x1c8] sm:$0xff] }
 0xabf   : > { %v2385_v46 = vmul.f32 -1.442695, %v1869_v45  ;;  %v2428_v45 = vld [vmem:[%s3854_s8 + $0x1c0] sm:$0xff] }
 0xac0   : > { %3045 = vpow2.f32 %v2386_v44  ;;  %v2426_v44 = vld [vmem:[%s3854_s8 + $0x1b0] sm:$0xff] }
 0xac1   : > { %3047 = vpow2.f32 %v2385_v46  ;;  %v2431_v46 = vld [vmem:[%s3854_s8 + $0x1d8] sm:$0xff] }
 0xaca   : > { %v3046_v21 = vpop.eup %3045 }
 0xacb   : > { %v3048_v25 = vpop.eup %3047  ;;  %v1885_v47 = vadd.f32 1.0, %v3046_v21  ;;  %v2433_v21 = vld [vmem:[%s3854_s8 + $0x1e8] sm:$0xff] }
 0xacc   : > { %v1884_v48 = vadd.f32 1.0, %v3048_v25  ;;  %v2423_v25 = vld [vmem:[%s3854_s8 + $0x1a0] sm:$0xff]  ;;  %v2858_v24 = vpack.c.bf16 %v2433_v21, %v2431_v46 }
 0xacd   : > { %3049 = vrcp.f32 %v1885_v47  ;;  %v2854_v47 = vpack.c.bf16 %v2429_v43, %v2427_v42 }
 0xace   : > { %3051 = vrcp.f32 %v1884_v48  ;;  %v2856_v48 = vpack.c.bf16 %v2428_v45, %v2426_v44 }
 0xad7   : > { %v3679_v50 = vpop.eup %3049 }
 0xad8   : > { %v3052_v51 = vpop.eup %3051  ;;  %v2097_v53 = vrot.slane %v3679_v50, 6  ;;  %v2193_v61 = vrot.slane %v3679_v50, 1 }
 0xad9   : > { %v1928_v29 = vrot.slane %v3052_v51, 3  ;;  %v2096_v54 = vrot.slane %v3052_v51, 6 }
 0xadb   : > { %2405 = vmatmul.mubr.msk.f32.vlgmr.msra.gmra.mrb[14].mxu1 %vm1929_vm15, %v1928_v29  ;;  %v3696_v57 = vsel %vm589_vm4, %v2096_v54, %v2097_v53  ;;  %v2434_v29 = vld [vmem:[%s3854_s8 + $0x1f0] sm:$0xff]  ;;  %v2866_v54 = vpack.c.bf16 %v2441_v39, %v2439_v34 }
 0xadc   : > { %2825 = vmatpush1.bf16.msra.mxu1 %v2824_v52  ;;  %2069 = vmatprep.mubr.f32.mxu1 %v3061_v0  ;;  %v2860_v52 = vpack.c.bf16 %v2432_v27, %v2430_v26 }
 0xadd   : > { %2827 = vmatprep.subr.bf16.mxu1 %v2826_v33  ;;  %v2436_v33 = vld [vmem:[%s3854_s8 + $0x200] sm:$0xff] }
 0xae0   : > { %2829 = vmatpush1.bf16.msra.mxu1 %v2828_v58  ;;  %v2443_v58 = vld [vmem:[%s3854_s8 + $0x238] sm:$0xff] }
 0xae1   : > { %2831 = vmatprep.subr.bf16.mxu1 %v2830_v59  ;;  %v2442_v59 = vld [vmem:[%s3854_s8 + $0x230] sm:$0xff] }
 0xae4   : > { %2833 = vmatpush1.bf16.msra.mxu1 %v2832_v3 }
 0xae5   : > { %2835 = vmatprep.subr.bf16.mxu1 %v2834_v60 }
 0xae8   : > { %2837 = vmatpush1.bf16.msra.mxu1 %v2836_v6 }
 0xae9   : > { %2021 = vmatprep.subr.mxu1 %v1907_v7 }
 0xaec   : > { %2022 = vmatpush1.msra.mxu1 %v1906_v13 }
 0xaed   : > { %2406 = vmatmul.mubr.msk.f32.vlgmr.msra.gmra.mrb[14].mxu1 %vm1929_vm15, %v3052_v51  ;;  %2839 = vmatprep.subr.bf16.mxu1 %v2838_v14  ;;  %v2437_v51 = vld [vmem:[%s3854_s8 + $0x208] sm:$0xff] }
 0xaee   : > { %2841 = vmatpush1.bf16.msra.mxu1 %v2840_v15  ;;  %2165 = vmatprep.mubr.f32.mxu1 %v3061_v0  ;;  %v2862_v53 = vpack.c.bf16 %v2437_v51, %v2435_v49 }
 0xaef   : > { %2843 = vmatprep.subr.bf16.mxu1 %v2842_v16 }
 0xaf2   : > { %2845 = vmatpush1.bf16.msra.mxu1 %v2844_v28 }
 0xaf3   : > { %2847 = vmatprep.subr.bf16.mxu1 %v2846_v30 }
 0xaf6   : > { %2849 = vmatpush1.bf16.msra.mxu1 %v2848_v22 }
 0xaf7   : > { %2851 = vmatprep.subr.bf16.mxu1 %v2850_v23 }
 0xafa   : > { %2853 = vmatpush1.bf16.msra.mxu1 %v2852_v40 }
 0xafb   : > { %2117 = vmatprep.subr.mxu1 %v2424_v41 }
 0xafe   : > { %2118 = vmatpush1.msra.mxu1 %v2423_v25 }
 0xaff   : > { %2425 = vmatmul.mubr.msk.f32.vlgmr.msra.gmra.mrb[14].mxu1 %vm1929_vm15, %v3696_v57  ;;  %2855 = vmatprep.subr.bf16.mxu1 %v2854_v47  ;;  %v2868_v57 = vpack.c.bf16 %v2440_v56, %v2438_v55 }
 0xb00   : > { %2857 = vmatpush1.bf16.msra.mxu1 %v2856_v48  ;;  %2260 = vmatprep.mubr.f32.mxu1 %v3061_v0  ;;  %v2864_v0 = vpack.c.bf16 %v2436_v33, %v2434_v29 }
 0xb01   : > { %2859 = vmatprep.subr.bf16.mxu1 %v2858_v24 }
 0xb04   : > { %2861 = vmatpush1.bf16.msra.mxu1 %v2860_v52 }
 0xb05   : > { %2863 = vmatprep.subr.bf16.mxu1 %v2862_v53 }
 0xb08   : > { %2865 = vmatpush1.bf16.msra.mxu1 %v2864_v0 }
 0xb09   : > { %2867 = vmatprep.subr.bf16.mxu1 %v2866_v54 }
 0xb0c   : > { %2869 = vmatpush1.bf16.msra.mxu1 %v2868_v57 }
 0xb0d   : > { %2212 = vmatprep.subr.mxu1 %v2443_v58 }
 0xb10   : > { %2213 = vmatpush1.msra.mxu1 %v2442_v59 }
 0xb11   : > { %2444 = vmatmul.mubr.msk.f32.vlgmr.msra.gmra.mrb[14].mxu1 %vm1929_vm15, %v2193_v61 }
 0xbe4   : > { %v2262_v62 = vpop.f32.mrb[14].mxu1 }
 0xbe5   : > { %v2264_v63 = vpop.f32.mrb[15].mxu1 }
 0xbe6   : > { %v2271_v2 = vcombine.low %v2262_v62, %v2264_v63 }
 0xbe8   : > { %2273 = vst [vmem:[%s332_s12] sm:$0x77] %v2271_v2 }
 0xbe9 PF: > { %s19_s30 = sadd.s32 1, %s3059_s30  }
 0xbea   : > { %p16_p4 = scmp.ge.s32.totalorder %s19_s30, 4  }
 0xbec   :  { %18 = sbr.rel (!%p16_p4) target bundleno = 1 (0x1), region = 92 }

</bundles_post_ra>
